<compile_context>
chip_gen: v7x
topology: tpu7x:2x2x1
jax: 0.10.0
libtpu: 0.0.40
codegen_flags: <defaults>
</compile_context>

<pallas_src>
import numpy as np
import jax
import jax.numpy as jnp
from jax import lax
from jax.experimental import pallas as pl
from jax.experimental.pallas import tpu as pltpu

# ----- small, consistent config (mirrors Config but shrunk) -----------------
B = 2              # batch
L = 8              # pad_size (sequence length)
D = 32             # embed == dim_model
NUM_HEAD = 4
DIM_HEAD = D // NUM_HEAD
HIDDEN = 64        # FFN hidden
NUM_CLASSES = 2
NUM_ENCODER = 2
N_VOCAB = 50
LN_EPS = 1e-5

M = B * L                  # 16  token rows in the (M, D) activation slab
G = B * NUM_HEAD           # 8   attention groups (torch .view semantics)
GT = G * L                 # 64  grouped rows (grouped slab is (GT, DIM_HEAD))
REP = D // DIM_HEAD        # 4   grouped rows produced per token row

LANES = 128                # lane width of the packed parameter/constant slab


# --------------------------- pack layout (static) ---------------------------
def _layout():
    items = [
        ("wqkv",   (D, 3 * D)),
        ("wo",     (D, D)),
        ("w1",     (D, HIDDEN)),
        ("w2",     (HIDDEN, D)),
        ("wlane",  (D, NUM_CLASSES * M)),
        ("vecs",   (16, LANES)),                 # 9 bias/LN rows, padded
        ("e",      (GT, M)),
        ("et",     (M, GT)),
        ("fmask3", (GT, 3 * D)),
        ("f3",     (3 * D, 3 * DIM_HEAD)),
        ("fsp",    (DIM_HEAD, D)),
        ("amask",  (GT, GT)),
        ("dmask",  (M, NUM_CLASSES * M)),
        ("ssum2",  (NUM_CLASSES * M, NUM_CLASSES)),
        ("pool",   (B, M)),
    ]
    offs, row = {}, 0
    for name, (r, _c) in items:
        offs[name] = row
        row += ((r + 7) // 8) * 8               # 8-sublane aligned row blocks
    return offs, row


PACK_OFF, PACK_ROWS = _layout()


# --------------------------- single fused kernel -----------------------------
def _fused_forward_kernel(h_ref, pk_ref, out_ref):
    f32 = jnp.float32

    def take(name, r, c):
        return pk_ref[pl.ds(PACK_OFF[name], r), pl.ds(0, c)]

    def vec(row, c):
        return pk_ref[pl.ds(PACK_OFF["vecs"] + row, 1), pl.ds(0, c)]

    # ---- hoisted loads: weights / biases / constants shared by both layers --
    wqkv   = take("wqkv", D, 3 * D)              # Q-cols pre-scaled by 1/sqrt(dh)
    wo     = take("wo", D, D)
    w1     = take("w1", D, HIDDEN)
    w2     = take("w2", HIDDEN, D)
    wlane  = take("wlane", D, NUM_CLASSES * M)
    e_mat  = take("e", GT, M)                    # expand rows -> grouped rows
    et_mat = take("et", M, GT)                   # collapse grouped -> token rows
    fmask3 = take("fmask3", GT, 3 * D)           # fold mask for fused QKV slab
    f3     = take("f3", 3 * D, 3 * DIM_HEAD)     # block-diag fold matrix
    fsp    = take("fsp", DIM_HEAD, D)            # spread matrix (inverse fold)
    amask  = take("amask", GT, GT)               # additive block-diag mask (0/-1e30)
    dmask  = take("dmask", M, NUM_CLASSES * M)   # classifier diag selector
    ssum2  = take("ssum2", NUM_CLASSES * M, NUM_CLASSES)
    pool   = take("pool", B, M)                  # batch row-pooling

    bqkv = vec(0, 3 * D)
    bo   = vec(1, D)
    ln1g = vec(2, D)
    ln1b = vec(3, D)
    b1   = vec(4, HIDDEN)
    b2   = vec(5, D)
    ln2g = vec(6, D)
    ln2b = vec(7, D)
    bcls = vec(8, NUM_CLASSES)

    fmask_d = fmask3[:, 0:D]                     # (GT, D) fold mask for one slab

    def add_ln(x, res, g, b):
        y = x + res
        mean = jnp.mean(y, axis=-1, keepdims=True)
        cdev = y - mean
        var = jnp.mean(cdev * cdev, axis=-1, keepdims=True)
        return cdev * lax.rsqrt(var + LN_EPS) * g + b

    h = h_ref[...]                               # (M, D)
    for _ in range(NUM_ENCODER):                 # shared weights (deepcopy init)
        # ---- multi-head attention ------------------------------------------
        qkv = jnp.dot(h, wqkv, preferred_element_type=f32) + bqkv        # (M, 3D)
        # torch .view(B*num_head, -1, dim_head) regrouping via constant matmuls
        a = jnp.dot(e_mat, qkv, preferred_element_type=f32)              # (GT, 3D)
        grp = jnp.dot(a * fmask3, f3, preferred_element_type=f32)        # (GT, 3*dh)
        qg = grp[:, 0:DIM_HEAD]
        kg = grp[:, DIM_HEAD:2 * DIM_HEAD]
        vg = grp[:, 2 * DIM_HEAD:3 * DIM_HEAD]
        s = lax.dot_general(qg, kg, (((1,), (1,)), ((), ())),
                            preferred_element_type=f32) + amask          # (GT, GT)
        s = s - jnp.max(s, axis=-1, keepdims=True)
        p = jnp.exp(s)
        p = p * pl.reciprocal(jnp.sum(p, axis=-1, keepdims=True), approx=True)
        ctxg = jnp.dot(p, vg, preferred_element_type=f32)                # (GT, dh)
        spread = jnp.dot(ctxg, fsp, preferred_element_type=f32) * fmask_d  # (GT, D)
        ctx = jnp.dot(et_mat, spread, preferred_element_type=f32)        # (M, D)
        attn = jnp.dot(ctx, wo, preferred_element_type=f32) + bo
        h = add_ln(attn, h, ln1g, ln1b)

        # ---- position-wise feed-forward -------------------------------------
        u = jnp.maximum(jnp.dot(h, w1, preferred_element_type=f32) + b1, 0.0)
        o = jnp.dot(u, w2, preferred_element_type=f32) + b2
        h = add_ln(o, h, ln2g, ln2b)

    # ---- classifier head on flattened (B, L*D) activations, all-matmul ------
    t = jnp.dot(h, wlane, preferred_element_type=f32) * dmask            # (M, NC*M)
    c2 = jnp.dot(t, ssum2, preferred_element_type=f32)                   # (M, NC)
    out_ref[...] = jnp.dot(pool, c2, preferred_element_type=f32) + bcls  # (B, NC)


@jax.jit
def model_forward(x_ids, emb, pe, pack):
    # embedding lookup + positional encoding (JAX glue)
    h0 = (emb[x_ids] + pe[None, :, :]).reshape(M, D)
    return pl.pallas_call(
        _fused_forward_kernel,
        out_shape=jax.ShapeDtypeStruct((B, NUM_CLASSES), jnp.float32),
        in_specs=[pl.BlockSpec(memory_space=pltpu.MemorySpace.VMEM),
                  pl.BlockSpec(memory_space=pltpu.MemorySpace.VMEM)],
        out_specs=pl.BlockSpec(memory_space=pltpu.MemorySpace.VMEM),
    )(h0, pack)


# ------------------------------ params ---------------------------------------
def positional_encoding_table():
    pos = np.arange(L, dtype=np.float64)[:, None]
    i = np.arange(D, dtype=np.float64)[None, :]
    pe = pos / (10000.0 ** ((np.floor(i / 2) * 2.0) / D))
    pe[:, 0::2] = np.sin(pe[:, 0::2])
    pe[:, 1::2] = np.cos(pe[:, 1::2])
    return jnp.asarray(pe, jnp.float32)


def init_params(key):
    ks = jax.random.split(key, 16)

    def w(k, shape, s=0.05):
        return jax.random.normal(k, shape, jnp.float32) * s

    emb = w(ks[0], (N_VOCAB, D)).at[N_VOCAB - 1].set(0.0)   # padding_idx = n_vocab-1

    # PyTorch nn.Linear weights are (out, in); pre-transpose once to (in, out)
    # and fuse Q/K/V into a single (D, 3D) projection.
    wq, wk, wv = w(ks[1], (D, D)), w(ks[2], (D, D)), w(ks[3], (D, D))
    wqkv = jnp.concatenate([wq.T, wk.T, wv.T], axis=1)           # (D, 3D)

    return {
        "embedding": emb,
        "pe": positional_encoding_table(),
        "wqkv": wqkv,
        "bqkv": w(ks[8], (1, 3 * D), 0.02),
        "wo": w(ks[4], (D, D)).T,                                # (D, D)
        "bo": w(ks[9], (1, D), 0.02),
        "ln1_g": jnp.ones((1, D), jnp.float32) + w(ks[10], (1, D), 0.02),
        "ln1_b": w(ks[11], (1, D), 0.02),
        "w1": w(ks[5], (HIDDEN, D)).T,                           # (D, HIDDEN)
        "b1": w(ks[12], (1, HIDDEN), 0.02),
        "w2": w(ks[6], (D, HIDDEN)).T,                           # (HIDDEN, D)
        "b2": w(ks[13], (1, D), 0.02),
        "ln2_g": jnp.ones((1, D), jnp.float32) + w(ks[14], (1, D), 0.02),
        "ln2_b": w(ks[15], (1, D), 0.02),
        "w_cls": w(ks[7], (NUM_CLASSES, L * D)),                 # torch layout (out, in)
        "b_cls": w(ks[8], (1, NUM_CLASSES), 0.02),
    }


# --------------- host-side one-time packing of params + constants -----------
def build_pack(p):
    pk = np.zeros((PACK_ROWS, LANES), np.float32)

    def put(name, arr):
        arr = np.asarray(arr, np.float32)
        r, c = arr.shape
        off = PACK_OFF[name]
        pk[off:off + r, :c] = arr

    scale = DIM_HEAD ** (-0.5)

    wqkv = np.asarray(p["wqkv"], np.float32).copy()
    wqkv[:, :D] *= scale                       # fold attention scale into Q proj
    put("wqkv", wqkv)
    put("wo", p["wo"]); put("w1", p["w1"]); put("w2", p["w2"])

    # classifier: wlane[d, n*M+m] = W_cls[n, (m % L)*D + d]
    wcls = np.asarray(p["w_cls"], np.float32).reshape(NUM_CLASSES, L, D)
    wlane = np.zeros((D, NUM_CLASSES * M), np.float32)
    for n in range(NUM_CLASSES):
        for m in range(M):
            wlane[:, n * M + m] = wcls[n, m % L, :]
    put("wlane", wlane)

    # bias / LN vectors (one row each)
    vecs = np.zeros((16, LANES), np.float32)
    bqkv = np.asarray(p["bqkv"], np.float32).reshape(-1).copy()
    bqkv[:D] *= scale
    vecs[0, :3 * D] = bqkv
    vecs[1, :D] = np.asarray(p["bo"]).reshape(-1)
    vecs[2, :D] = np.asarray(p["ln1_g"]).reshape(-1)
    vecs[3, :D] = np.asarray(p["ln1_b"]).reshape(-1)
    vecs[4, :HIDDEN] = np.asarray(p["b1"]).reshape(-1)
    vecs[5, :D] = np.asarray(p["b2"]).reshape(-1)
    vecs[6, :D] = np.asarray(p["ln2_g"]).reshape(-1)
    vecs[7, :D] = np.asarray(p["ln2_b"]).reshape(-1)
    vecs[8, :NUM_CLASSES] = np.asarray(p["b_cls"]).reshape(-1)
    put("vecs", vecs)

    # constant selection / mask matrices (torch .view regrouping + attention)
    mg = np.arange(GT)
    mm = np.arange(M)
    e = (mg[:, None] // REP == mm[None, :]).astype(np.float32)       # (GT, M)
    put("e", e)
    put("et", e.T)                                                    # (M, GT)
    c3 = np.arange(3 * D)
    put("fmask3", ((c3[None, :] % D) // DIM_HEAD
                   == (mg[:, None] % REP)).astype(np.float32))        # (GT, 3D)
    ff = np.arange(3 * DIM_HEAD)
    put("f3", ((c3[:, None] // D == ff[None, :] // DIM_HEAD) &
               (c3[:, None] % DIM_HEAD == ff[None, :] % DIM_HEAD)
               ).astype(np.float32))                                  # (3D, 3*dh)
    cD = np.arange(D); ee = np.arange(DIM_HEAD)
    put("fsp", (cD[None, :] % DIM_HEAD == ee[:, None]).astype(np.float32))  # (dh, D)
    put("amask", np.where(mg[:, None] // L == mg[None, :] // L,
                          0.0, -1e30).astype(np.float32))             # (GT, GT)
    cc = np.arange(NUM_CLASSES * M)
    put("dmask", (mm[:, None] == cc[None, :] % M).astype(np.float32)) # (M, NC*M)
    put("ssum2", (cc[:, None] // M
                  == np.arange(NUM_CLASSES)[None, :]).astype(np.float32))
    put("pool", (np.arange(B)[:, None] == mm[None, :] // L).astype(np.float32))

    return jnp.asarray(pk)


# ------------------------- pure-JAX reference (sanity) ------------------------
def _ln_ref(y, g, b):
    mean = jnp.mean(y, axis=-1, keepdims=True)
    c = y - mean
    var = jnp.mean(c * c, axis=-1, keepdims=True)
    return c * lax.rsqrt(var + LN_EPS) * g + b


def reference_forward(x_ids, p):
    h = (p["embedding"][x_ids] + p["pe"][None, :, :]).reshape(M, D)
    for _ in range(NUM_ENCODER):
        qkv = h @ p["wqkv"] + p["bqkv"]
        q, k, v = qkv[:, :D], qkv[:, D:2 * D], qkv[:, 2 * D:]
        qg = q.reshape(G, -1, DIM_HEAD)        # same element order as torch .view
        kg = k.reshape(G, -1, DIM_HEAD)
        vg = v.reshape(G, -1, DIM_HEAD)
        s = jnp.einsum("gte,gse->gts", qg, kg) * DIM_HEAD ** (-0.5)
        a = jax.nn.softmax(s, axis=-1)
        ctx = jnp.einsum("gts,gse->gte", a, vg).reshape(M, D)
        attn = ctx @ p["wo"] + p["bo"]
        h = _ln_ref(attn + h, p["ln1_g"], p["ln1_b"])
        u = jnp.maximum(h @ p["w1"] + p["b1"], 0.0)
        o = u @ p["w2"] + p["b2"]
        h = _ln_ref(o + h, p["ln2_g"], p["ln2_b"])
    flat = h.reshape(B, L * D)
    return flat @ p["w_cls"].T + p["b_cls"]


if __name__ == "__main__":
    key = jax.random.PRNGKey(0)
    k_ids, k_par = jax.random.split(key)
    x = jax.random.randint(k_ids, (B, L), 0, N_VOCAB, dtype=jnp.int32)
    params = init_params(k_par)
    pack = build_pack(params)

    logits = jax.block_until_ready(
        model_forward(x, params["embedding"], params["pe"], pack))

    assert logits.shape == (B, NUM_CLASSES)
    assert bool(jnp.all(jnp.isfinite(logits)))

    ref = reference_forward(x, params)
    np.testing.assert_allclose(np.asarray(logits), np.asarray(ref),
                               rtol=2e-2, atol=2e-2)
    print("KERNEL_OK")
</pallas_src>

<mosaic_0001>
module attributes {stable_mosaic.version = 11 : i64} {
  func.func @_fused_forward_kernel(%arg0: memref<16x32xf32, #tpu.memory_space<vmem>>, %arg1: memref<576x128xf32, #tpu.memory_space<vmem>>, %arg2: memref<2x2xf32, #tpu.memory_space<vmem>>) attributes {dimension_semantics = [], scalar_prefetch = 0 : i64, scratch_operands = 0 : i64, tpu.core_type = #tpu.core_type<tc>} {
    %c0 = arith.constant 0 : index
    %c0_0 = arith.constant 0 : index
    %0 = vector.load %arg1[%c0, %c0_0] : memref<576x128xf32, #tpu.memory_space<vmem>>, vector<32x96xf32>
    %c32 = arith.constant 32 : index
    %c0_1 = arith.constant 0 : index
    %1 = vector.load %arg1[%c32, %c0_1] : memref<576x128xf32, #tpu.memory_space<vmem>>, vector<32x32xf32>
    %c64 = arith.constant 64 : index
    %c0_2 = arith.constant 0 : index
    %2 = vector.load %arg1[%c64, %c0_2] : memref<576x128xf32, #tpu.memory_space<vmem>>, vector<32x64xf32>
    %c96 = arith.constant 96 : index
    %c0_3 = arith.constant 0 : index
    %3 = vector.load %arg1[%c96, %c0_3] : memref<576x128xf32, #tpu.memory_space<vmem>>, vector<64x32xf32>
    %c160 = arith.constant 160 : index
    %c0_4 = arith.constant 0 : index
    %4 = vector.load %arg1[%c160, %c0_4] : memref<576x128xf32, #tpu.memory_space<vmem>>, vector<32x32xf32>
    %c208 = arith.constant 208 : index
    %c0_5 = arith.constant 0 : index
    %5 = vector.load %arg1[%c208, %c0_5] : memref<576x128xf32, #tpu.memory_space<vmem>>, vector<64x16xf32>
    %c272 = arith.constant 272 : index
    %c0_6 = arith.constant 0 : index
    %6 = vector.load %arg1[%c272, %c0_6] : memref<576x128xf32, #tpu.memory_space<vmem>>, vector<16x64xf32>
    %c288 = arith.constant 288 : index
    %c0_7 = arith.constant 0 : index
    %7 = vector.load %arg1[%c288, %c0_7] : memref<576x128xf32, #tpu.memory_space<vmem>>, vector<64x96xf32>
    %c352 = arith.constant 352 : index
    %c0_8 = arith.constant 0 : index
    %8 = vector.load %arg1[%c352, %c0_8] : memref<576x128xf32, #tpu.memory_space<vmem>>, vector<96x24xf32>
    %c448 = arith.constant 448 : index
    %c0_9 = arith.constant 0 : index
    %9 = vector.load %arg1[%c448, %c0_9] : memref<576x128xf32, #tpu.memory_space<vmem>>, vector<8x32xf32>
    %c456 = arith.constant 456 : index
    %c0_10 = arith.constant 0 : index
    %10 = vector.load %arg1[%c456, %c0_10] : memref<576x128xf32, #tpu.memory_space<vmem>>, vector<64x64xf32>
    %c520 = arith.constant 520 : index
    %c0_11 = arith.constant 0 : index
    %11 = vector.load %arg1[%c520, %c0_11] : memref<576x128xf32, #tpu.memory_space<vmem>>, vector<16x32xf32>
    %c536 = arith.constant 536 : index
    %c0_12 = arith.constant 0 : index
    %12 = vector.load %arg1[%c536, %c0_12] : memref<576x128xf32, #tpu.memory_space<vmem>>, vector<32x2xf32>
    %c568 = arith.constant 568 : index
    %c0_13 = arith.constant 0 : index
    %13 = vector.load %arg1[%c568, %c0_13] : memref<576x128xf32, #tpu.memory_space<vmem>>, vector<2x16xf32>
    %c192 = arith.constant 192 : index
    %c0_14 = arith.constant 0 : index
    %14 = vector.load %arg1[%c192, %c0_14] : memref<576x128xf32, #tpu.memory_space<vmem>>, vector<1x96xf32>
    %c193 = arith.constant 193 : index
    %c0_15 = arith.constant 0 : index
    %15 = vector.load %arg1[%c193, %c0_15] : memref<576x128xf32, #tpu.memory_space<vmem>>, vector<1x32xf32>
    %c194 = arith.constant 194 : index
    %c0_16 = arith.constant 0 : index
    %16 = vector.load %arg1[%c194, %c0_16] : memref<576x128xf32, #tpu.memory_space<vmem>>, vector<1x32xf32>
    %c195 = arith.constant 195 : index
    %c0_17 = arith.constant 0 : index
    %17 = vector.load %arg1[%c195, %c0_17] : memref<576x128xf32, #tpu.memory_space<vmem>>, vector<1x32xf32>
    %c196 = arith.constant 196 : index
    %c0_18 = arith.constant 0 : index
    %18 = vector.load %arg1[%c196, %c0_18] : memref<576x128xf32, #tpu.memory_space<vmem>>, vector<1x64xf32>
    %c197 = arith.constant 197 : index
    %c0_19 = arith.constant 0 : index
    %19 = vector.load %arg1[%c197, %c0_19] : memref<576x128xf32, #tpu.memory_space<vmem>>, vector<1x32xf32>
    %c198 = arith.constant 198 : index
    %c0_20 = arith.constant 0 : index
    %20 = vector.load %arg1[%c198, %c0_20] : memref<576x128xf32, #tpu.memory_space<vmem>>, vector<1x32xf32>
    %c199 = arith.constant 199 : index
    %c0_21 = arith.constant 0 : index
    %21 = vector.load %arg1[%c199, %c0_21] : memref<576x128xf32, #tpu.memory_space<vmem>>, vector<1x32xf32>
    %c200 = arith.constant 200 : index
    %c0_22 = arith.constant 0 : index
    %22 = vector.load %arg1[%c200, %c0_22] : memref<576x128xf32, #tpu.memory_space<vmem>>, vector<1x2xf32>
    %23 = vector.extract_strided_slice %7 {offsets = [0, 0], sizes = [64, 32], strides = [1, 1]} : vector<64x96xf32> to vector<64x32xf32>
    %c0_23 = arith.constant 0 : index
    %c0_24 = arith.constant 0 : index
    %24 = vector.load %arg0[%c0_23, %c0_24] : memref<16x32xf32, #tpu.memory_space<vmem>>, vector<16x32xf32>
    %cst = arith.constant dense<0.000000e+00> : vector<16x96xf32>
    %25 = tpu.matmul %24, %0, %cst {dimension_numbers = #tpu.dot_dimension_numbers<[1], [0], [0], [1], [0, 0, 1, 1], [], []>} : vector<16x32xf32>, vector<32x96xf32>, vector<16x96xf32> -> vector<16x96xf32>
    %26 = vector.broadcast %14 : vector<1x96xf32> to vector<16x96xf32>
    %27 = arith.addf %25, %26 : vector<16x96xf32>
    %cst_25 = arith.constant dense<0.000000e+00> : vector<64x96xf32>
    %28 = tpu.matmul %5, %27, %cst_25 {dimension_numbers = #tpu.dot_dimension_numbers<[1], [0], [0], [1], [0, 0, 1, 1], [], []>} : vector<64x16xf32>, vector<16x96xf32>, vector<64x96xf32> -> vector<64x96xf32>
    %29 = arith.mulf %28, %7 : vector<64x96xf32>
    %cst_26 = arith.constant dense<0.000000e+00> : vector<64x24xf32>
    %30 = tpu.matmul %29, %8, %cst_26 {dimension_numbers = #tpu.dot_dimension_numbers<[1], [0], [0], [1], [0, 0, 1, 1], [], []>} : vector<64x96xf32>, vector<96x24xf32>, vector<64x24xf32> -> vector<64x24xf32>
    %31 = vector.extract_strided_slice %30 {offsets = [0, 0], sizes = [64, 8], strides = [1, 1]} : vector<64x24xf32> to vector<64x8xf32>
    %32 = vector.extract_strided_slice %30 {offsets = [0, 8], sizes = [64, 8], strides = [1, 1]} : vector<64x24xf32> to vector<64x8xf32>
    %33 = vector.extract_strided_slice %30 {offsets = [0, 16], sizes = [64, 8], strides = [1, 1]} : vector<64x24xf32> to vector<64x8xf32>
    %cst_27 = arith.constant dense<0.000000e+00> : vector<64x64xf32>
    %34 = tpu.matmul %31, %32, %cst_27 {dimension_numbers = #tpu.dot_dimension_numbers<[1], [1], [0], [0], [0, 0, 1, 0], [], []>} : vector<64x8xf32>, vector<64x8xf32>, vector<64x64xf32> -> vector<64x64xf32>
    %35 = arith.addf %34, %10 : vector<64x64xf32>
    %cst_28 = arith.constant dense<0xFF800000> : vector<64xf32>
    %36 = vector.multi_reduction <maximumf>, %35, %cst_28 [1] : vector<64x64xf32> to vector<64xf32>
    %37 = vector.shape_cast %36 : vector<64xf32> to vector<64x1xf32>
    %38 = vector.broadcast %37 : vector<64x1xf32> to vector<64x64xf32>
    %39 = arith.subf %35, %38 : vector<64x64xf32>
    %40 = math.exp %39 : vector<64x64xf32>
    %cst_29 = arith.constant dense<0.000000e+00> : vector<64xf32>
    %41 = vector.multi_reduction <add>, %40, %cst_29 [1] : vector<64x64xf32> to vector<64xf32>
    %42 = vector.shape_cast %41 : vector<64xf32> to vector<64x1xf32>
    %43 = tpu.reciprocal %42 {approx = true} : vector<64x1xf32> -> vector<64x1xf32>
    %44 = vector.broadcast %43 : vector<64x1xf32> to vector<64x64xf32>
    %45 = arith.mulf %40, %44 : vector<64x64xf32>
    %cst_30 = arith.constant dense<0.000000e+00> : vector<64x8xf32>
    %46 = tpu.matmul %45, %33, %cst_30 {dimension_numbers = #tpu.dot_dimension_numbers<[1], [0], [0], [1], [0, 0, 1, 1], [], []>} : vector<64x64xf32>, vector<64x8xf32>, vector<64x8xf32> -> vector<64x8xf32>
    %cst_31 = arith.constant dense<0.000000e+00> : vector<64x32xf32>
    %47 = tpu.matmul %46, %9, %cst_31 {dimension_numbers = #tpu.dot_dimension_numbers<[1], [0], [0], [1], [0, 0, 1, 1], [], []>} : vector<64x8xf32>, vector<8x32xf32>, vector<64x32xf32> -> vector<64x32xf32>
    %48 = arith.mulf %47, %23 : vector<64x32xf32>
    %cst_32 = arith.constant dense<0.000000e+00> : vector<16x32xf32>
    %49 = tpu.matmul %6, %48, %cst_32 {dimension_numbers = #tpu.dot_dimension_numbers<[1], [0], [0], [1], [0, 0, 1, 1], [], []>} : vector<16x64xf32>, vector<64x32xf32>, vector<16x32xf32> -> vector<16x32xf32>
    %cst_33 = arith.constant dense<0.000000e+00> : vector<16x32xf32>
    %50 = tpu.matmul %49, %1, %cst_33 {dimension_numbers = #tpu.dot_dimension_numbers<[1], [0], [0], [1], [0, 0, 1, 1], [], []>} : vector<16x32xf32>, vector<32x32xf32>, vector<16x32xf32> -> vector<16x32xf32>
    %51 = vector.broadcast %15 : vector<1x32xf32> to vector<16x32xf32>
    %52 = arith.addf %50, %51 : vector<16x32xf32>
    %53 = arith.addf %52, %24 : vector<16x32xf32>
    %cst_34 = arith.constant dense<0.000000e+00> : vector<16xf32>
    %54 = vector.multi_reduction <add>, %53, %cst_34 [1] : vector<16x32xf32> to vector<16xf32>
    %55 = vector.shape_cast %54 : vector<16xf32> to vector<16x1xf32>
    %cst_35 = arith.constant 3.200000e+01 : f32
    %56 = vector.broadcast %cst_35 : f32 to vector<16x1xf32>
    %57 = arith.divf %55, %56 : vector<16x1xf32>
    %58 = vector.broadcast %57 : vector<16x1xf32> to vector<16x32xf32>
    %59 = arith.subf %53, %58 : vector<16x32xf32>
    %60 = arith.mulf %59, %59 : vector<16x32xf32>
    %cst_36 = arith.constant dense<0.000000e+00> : vector<16xf32>
    %61 = vector.multi_reduction <add>, %60, %cst_36 [1] : vector<16x32xf32> to vector<16xf32>
    %62 = vector.shape_cast %61 : vector<16xf32> to vector<16x1xf32>
    %cst_37 = arith.constant 3.200000e+01 : f32
    %63 = vector.broadcast %cst_37 : f32 to vector<16x1xf32>
    %64 = arith.divf %62, %63 : vector<16x1xf32>
    %cst_38 = arith.constant 9.99999974E-6 : f32
    %65 = vector.broadcast %cst_38 : f32 to vector<16x1xf32>
    %66 = arith.addf %64, %65 : vector<16x1xf32>
    %67 = math.rsqrt %66 : vector<16x1xf32>
    %68 = vector.broadcast %67 : vector<16x1xf32> to vector<16x32xf32>
    %69 = arith.mulf %59, %68 : vector<16x32xf32>
    %70 = vector.broadcast %16 : vector<1x32xf32> to vector<16x32xf32>
    %71 = arith.mulf %69, %70 : vector<16x32xf32>
    %72 = vector.broadcast %17 : vector<1x32xf32> to vector<16x32xf32>
    %73 = arith.addf %71, %72 : vector<16x32xf32>
    %cst_39 = arith.constant dense<0.000000e+00> : vector<16x64xf32>
    %74 = tpu.matmul %73, %2, %cst_39 {dimension_numbers = #tpu.dot_dimension_numbers<[1], [0], [0], [1], [0, 0, 1, 1], [], []>} : vector<16x32xf32>, vector<32x64xf32>, vector<16x64xf32> -> vector<16x64xf32>
    %75 = vector.broadcast %18 : vector<1x64xf32> to vector<16x64xf32>
    %76 = arith.addf %74, %75 : vector<16x64xf32>
    %cst_40 = arith.constant 0.000000e+00 : f32
    %77 = vector.broadcast %cst_40 : f32 to vector<16x64xf32>
    %78 = arith.maximumf %76, %77 : vector<16x64xf32>
    %cst_41 = arith.constant dense<0.000000e+00> : vector<16x32xf32>
    %79 = tpu.matmul %78, %3, %cst_41 {dimension_numbers = #tpu.dot_dimension_numbers<[1], [0], [0], [1], [0, 0, 1, 1], [], []>} : vector<16x64xf32>, vector<64x32xf32>, vector<16x32xf32> -> vector<16x32xf32>
    %80 = vector.broadcast %19 : vector<1x32xf32> to vector<16x32xf32>
    %81 = arith.addf %79, %80 : vector<16x32xf32>
    %82 = arith.addf %81, %73 : vector<16x32xf32>
    %cst_42 = arith.constant dense<0.000000e+00> : vector<16xf32>
    %83 = vector.multi_reduction <add>, %82, %cst_42 [1] : vector<16x32xf32> to vector<16xf32>
    %84 = vector.shape_cast %83 : vector<16xf32> to vector<16x1xf32>
    %cst_43 = arith.constant 3.200000e+01 : f32
    %85 = vector.broadcast %cst_43 : f32 to vector<16x1xf32>
    %86 = arith.divf %84, %85 : vector<16x1xf32>
    %87 = vector.broadcast %86 : vector<16x1xf32> to vector<16x32xf32>
    %88 = arith.subf %82, %87 : vector<16x32xf32>
    %89 = arith.mulf %88, %88 : vector<16x32xf32>
    %cst_44 = arith.constant dense<0.000000e+00> : vector<16xf32>
    %90 = vector.multi_reduction <add>, %89, %cst_44 [1] : vector<16x32xf32> to vector<16xf32>
    %91 = vector.shape_cast %90 : vector<16xf32> to vector<16x1xf32>
    %cst_45 = arith.constant 3.200000e+01 : f32
    %92 = vector.broadcast %cst_45 : f32 to vector<16x1xf32>
    %93 = arith.divf %91, %92 : vector<16x1xf32>
    %cst_46 = arith.constant 9.99999974E-6 : f32
    %94 = vector.broadcast %cst_46 : f32 to vector<16x1xf32>
    %95 = arith.addf %93, %94 : vector<16x1xf32>
    %96 = math.rsqrt %95 : vector<16x1xf32>
    %97 = vector.broadcast %96 : vector<16x1xf32> to vector<16x32xf32>
    %98 = arith.mulf %88, %97 : vector<16x32xf32>
    %99 = vector.broadcast %20 : vector<1x32xf32> to vector<16x32xf32>
    %100 = arith.mulf %98, %99 : vector<16x32xf32>
    %101 = vector.broadcast %21 : vector<1x32xf32> to vector<16x32xf32>
    %102 = arith.addf %100, %101 : vector<16x32xf32>
    %cst_47 = arith.constant dense<0.000000e+00> : vector<16x96xf32>
    %103 = tpu.matmul %102, %0, %cst_47 {dimension_numbers = #tpu.dot_dimension_numbers<[1], [0], [0], [1], [0, 0, 1, 1], [], []>} : vector<16x32xf32>, vector<32x96xf32>, vector<16x96xf32> -> vector<16x96xf32>
    %104 = vector.broadcast %14 : vector<1x96xf32> to vector<16x96xf32>
    %105 = arith.addf %103, %104 : vector<16x96xf32>
    %cst_48 = arith.constant dense<0.000000e+00> : vector<64x96xf32>
    %106 = tpu.matmul %5, %105, %cst_48 {dimension_numbers = #tpu.dot_dimension_numbers<[1], [0], [0], [1], [0, 0, 1, 1], [], []>} : vector<64x16xf32>, vector<16x96xf32>, vector<64x96xf32> -> vector<64x96xf32>
    %107 = arith.mulf %106, %7 : vector<64x96xf32>
    %cst_49 = arith.constant dense<0.000000e+00> : vector<64x24xf32>
    %108 = tpu.matmul %107, %8, %cst_49 {dimension_numbers = #tpu.dot_dimension_numbers<[1], [0], [0], [1], [0, 0, 1, 1], [], []>} : vector<64x96xf32>, vector<96x24xf32>, vector<64x24xf32> -> vector<64x24xf32>
    %109 = vector.extract_strided_slice %108 {offsets = [0, 0], sizes = [64, 8], strides = [1, 1]} : vector<64x24xf32> to vector<64x8xf32>
    %110 = vector.extract_strided_slice %108 {offsets = [0, 8], sizes = [64, 8], strides = [1, 1]} : vector<64x24xf32> to vector<64x8xf32>
    %111 = vector.extract_strided_slice %108 {offsets = [0, 16], sizes = [64, 8], strides = [1, 1]} : vector<64x24xf32> to vector<64x8xf32>
    %cst_50 = arith.constant dense<0.000000e+00> : vector<64x64xf32>
    %112 = tpu.matmul %109, %110, %cst_50 {dimension_numbers = #tpu.dot_dimension_numbers<[1], [1], [0], [0], [0, 0, 1, 0], [], []>} : vector<64x8xf32>, vector<64x8xf32>, vector<64x64xf32> -> vector<64x64xf32>
    %113 = arith.addf %112, %10 : vector<64x64xf32>
    %cst_51 = arith.constant dense<0xFF800000> : vector<64xf32>
    %114 = vector.multi_reduction <maximumf>, %113, %cst_51 [1] : vector<64x64xf32> to vector<64xf32>
    %115 = vector.shape_cast %114 : vector<64xf32> to vector<64x1xf32>
    %116 = vector.broadcast %115 : vector<64x1xf32> to vector<64x64xf32>
    %117 = arith.subf %113, %116 : vector<64x64xf32>
    %118 = math.exp %117 : vector<64x64xf32>
    %cst_52 = arith.constant dense<0.000000e+00> : vector<64xf32>
    %119 = vector.multi_reduction <add>, %118, %cst_52 [1] : vector<64x64xf32> to vector<64xf32>
    %120 = vector.shape_cast %119 : vector<64xf32> to vector<64x1xf32>
    %121 = tpu.reciprocal %120 {approx = true} : vector<64x1xf32> -> vector<64x1xf32>
    %122 = vector.broadcast %121 : vector<64x1xf32> to vector<64x64xf32>
    %123 = arith.mulf %118, %122 : vector<64x64xf32>
    %cst_53 = arith.constant dense<0.000000e+00> : vector<64x8xf32>
    %124 = tpu.matmul %123, %111, %cst_53 {dimension_numbers = #tpu.dot_dimension_numbers<[1], [0], [0], [1], [0, 0, 1, 1], [], []>} : vector<64x64xf32>, vector<64x8xf32>, vector<64x8xf32> -> vector<64x8xf32>
    %cst_54 = arith.constant dense<0.000000e+00> : vector<64x32xf32>
    %125 = tpu.matmul %124, %9, %cst_54 {dimension_numbers = #tpu.dot_dimension_numbers<[1], [0], [0], [1], [0, 0, 1, 1], [], []>} : vector<64x8xf32>, vector<8x32xf32>, vector<64x32xf32> -> vector<64x32xf32>
    %126 = arith.mulf %125, %23 : vector<64x32xf32>
    %cst_55 = arith.constant dense<0.000000e+00> : vector<16x32xf32>
    %127 = tpu.matmul %6, %126, %cst_55 {dimension_numbers = #tpu.dot_dimension_numbers<[1], [0], [0], [1], [0, 0, 1, 1], [], []>} : vector<16x64xf32>, vector<64x32xf32>, vector<16x32xf32> -> vector<16x32xf32>
    %cst_56 = arith.constant dense<0.000000e+00> : vector<16x32xf32>
    %128 = tpu.matmul %127, %1, %cst_56 {dimension_numbers = #tpu.dot_dimension_numbers<[1], [0], [0], [1], [0, 0, 1, 1], [], []>} : vector<16x32xf32>, vector<32x32xf32>, vector<16x32xf32> -> vector<16x32xf32>
    %129 = vector.broadcast %15 : vector<1x32xf32> to vector<16x32xf32>
    %130 = arith.addf %128, %129 : vector<16x32xf32>
    %131 = arith.addf %130, %102 : vector<16x32xf32>
    %cst_57 = arith.constant dense<0.000000e+00> : vector<16xf32>
    %132 = vector.multi_reduction <add>, %131, %cst_57 [1] : vector<16x32xf32> to vector<16xf32>
    %133 = vector.shape_cast %132 : vector<16xf32> to vector<16x1xf32>
    %cst_58 = arith.constant 3.200000e+01 : f32
    %134 = vector.broadcast %cst_58 : f32 to vector<16x1xf32>
    %135 = arith.divf %133, %134 : vector<16x1xf32>
    %136 = vector.broadcast %135 : vector<16x1xf32> to vector<16x32xf32>
    %137 = arith.subf %131, %136 : vector<16x32xf32>
    %138 = arith.mulf %137, %137 : vector<16x32xf32>
    %cst_59 = arith.constant dense<0.000000e+00> : vector<16xf32>
    %139 = vector.multi_reduction <add>, %138, %cst_59 [1] : vector<16x32xf32> to vector<16xf32>
    %140 = vector.shape_cast %139 : vector<16xf32> to vector<16x1xf32>
    %cst_60 = arith.constant 3.200000e+01 : f32
    %141 = vector.broadcast %cst_60 : f32 to vector<16x1xf32>
    %142 = arith.divf %140, %141 : vector<16x1xf32>
    %cst_61 = arith.constant 9.99999974E-6 : f32
    %143 = vector.broadcast %cst_61 : f32 to vector<16x1xf32>
    %144 = arith.addf %142, %143 : vector<16x1xf32>
    %145 = math.rsqrt %144 : vector<16x1xf32>
    %146 = vector.broadcast %145 : vector<16x1xf32> to vector<16x32xf32>
    %147 = arith.mulf %137, %146 : vector<16x32xf32>
    %148 = vector.broadcast %16 : vector<1x32xf32> to vector<16x32xf32>
    %149 = arith.mulf %147, %148 : vector<16x32xf32>
    %150 = vector.broadcast %17 : vector<1x32xf32> to vector<16x32xf32>
    %151 = arith.addf %149, %150 : vector<16x32xf32>
    %cst_62 = arith.constant dense<0.000000e+00> : vector<16x64xf32>
    %152 = tpu.matmul %151, %2, %cst_62 {dimension_numbers = #tpu.dot_dimension_numbers<[1], [0], [0], [1], [0, 0, 1, 1], [], []>} : vector<16x32xf32>, vector<32x64xf32>, vector<16x64xf32> -> vector<16x64xf32>
    %153 = vector.broadcast %18 : vector<1x64xf32> to vector<16x64xf32>
    %154 = arith.addf %152, %153 : vector<16x64xf32>
    %cst_63 = arith.constant 0.000000e+00 : f32
    %155 = vector.broadcast %cst_63 : f32 to vector<16x64xf32>
    %156 = arith.maximumf %154, %155 : vector<16x64xf32>
    %cst_64 = arith.constant dense<0.000000e+00> : vector<16x32xf32>
    %157 = tpu.matmul %156, %3, %cst_64 {dimension_numbers = #tpu.dot_dimension_numbers<[1], [0], [0], [1], [0, 0, 1, 1], [], []>} : vector<16x64xf32>, vector<64x32xf32>, vector<16x32xf32> -> vector<16x32xf32>
    %158 = vector.broadcast %19 : vector<1x32xf32> to vector<16x32xf32>
    %159 = arith.addf %157, %158 : vector<16x32xf32>
    %160 = arith.addf %159, %151 : vector<16x32xf32>
    %cst_65 = arith.constant dense<0.000000e+00> : vector<16xf32>
    %161 = vector.multi_reduction <add>, %160, %cst_65 [1] : vector<16x32xf32> to vector<16xf32>
    %162 = vector.shape_cast %161 : vector<16xf32> to vector<16x1xf32>
    %cst_66 = arith.constant 3.200000e+01 : f32
    %163 = vector.broadcast %cst_66 : f32 to vector<16x1xf32>
    %164 = arith.divf %162, %163 : vector<16x1xf32>
    %165 = vector.broadcast %164 : vector<16x1xf32> to vector<16x32xf32>
    %166 = arith.subf %160, %165 : vector<16x32xf32>
    %167 = arith.mulf %166, %166 : vector<16x32xf32>
    %cst_67 = arith.constant dense<0.000000e+00> : vector<16xf32>
    %168 = vector.multi_reduction <add>, %167, %cst_67 [1] : vector<16x32xf32> to vector<16xf32>
    %169 = vector.shape_cast %168 : vector<16xf32> to vector<16x1xf32>
    %cst_68 = arith.constant 3.200000e+01 : f32
    %170 = vector.broadcast %cst_68 : f32 to vector<16x1xf32>
    %171 = arith.divf %169, %170 : vector<16x1xf32>
    %cst_69 = arith.constant 9.99999974E-6 : f32
    %172 = vector.broadcast %cst_69 : f32 to vector<16x1xf32>
    %173 = arith.addf %171, %172 : vector<16x1xf32>
    %174 = math.rsqrt %173 : vector<16x1xf32>
    %175 = vector.broadcast %174 : vector<16x1xf32> to vector<16x32xf32>
    %176 = arith.mulf %166, %175 : vector<16x32xf32>
    %177 = vector.broadcast %20 : vector<1x32xf32> to vector<16x32xf32>
    %178 = arith.mulf %176, %177 : vector<16x32xf32>
    %179 = vector.broadcast %21 : vector<1x32xf32> to vector<16x32xf32>
    %180 = arith.addf %178, %179 : vector<16x32xf32>
    %cst_70 = arith.constant dense<0.000000e+00> : vector<16x32xf32>
    %181 = tpu.matmul %180, %4, %cst_70 {dimension_numbers = #tpu.dot_dimension_numbers<[1], [0], [0], [1], [0, 0, 1, 1], [], []>} : vector<16x32xf32>, vector<32x32xf32>, vector<16x32xf32> -> vector<16x32xf32>
    %182 = arith.mulf %181, %11 : vector<16x32xf32>
    %cst_71 = arith.constant dense<0.000000e+00> : vector<16x2xf32>
    %183 = tpu.matmul %182, %12, %cst_71 {dimension_numbers = #tpu.dot_dimension_numbers<[1], [0], [0], [1], [0, 0, 1, 1], [], []>} : vector<16x32xf32>, vector<32x2xf32>, vector<16x2xf32> -> vector<16x2xf32>
    %cst_72 = arith.constant dense<0.000000e+00> : vector<2x2xf32>
    %184 = tpu.matmul %13, %183, %cst_72 {dimension_numbers = #tpu.dot_dimension_numbers<[1], [0], [0], [1], [0, 0, 1, 1], [], []>} : vector<2x16xf32>, vector<16x2xf32>, vector<2x2xf32> -> vector<2x2xf32>
    %185 = vector.broadcast %22 : vector<1x2xf32> to vector<2x2xf32>
    %186 = arith.addf %184, %185 : vector<2x2xf32>
    %c0_73 = arith.constant 0 : index
    %c0_74 = arith.constant 0 : index
    %187 = vector.load %arg2[%c0_73, %c0_74] : memref<2x2xf32, #tpu.memory_space<vmem>>, vector<2x2xf32>
    tpu.vector_store %arg2[%c0_73, %c0_74], %186 {strides = array<i32>} : memref<2x2xf32, #tpu.memory_space<vmem>>, vector<2x2xf32>,
    return
  }
}

</mosaic_0001>

<bundles_post_ra>
// kernel: model_forward.1
= control target key start
LH: loop header
LB: loop body
LE: loop exit
PB: predicated region body
PF: predicated region fallthrough
CT: control target
= control target key end

     0   :  { %7 = vsyncpa [#allocation3], 0  ;;  %s4818_s0 = inlined_call_operand.vmem [shape: f32[16,32], index: 0, kind: input, shape index: {}]   ;;  %s4819_s1 = inlined_call_operand.hbm [shape: f32[576,128], index: 1, kind: input, shape index: {}]   ;;  %s4820_s2 = inlined_call_operand.hbm [shape: f32[2,2], index: 2, kind: output, shape index: {}]  }
   0x1   :  { %8 = vsyncpa [#allocation4], 0  ;;  %s4195_s9 = smov [#allocation2]   ;;  %s4147_s13 = scalar_lea.hbm %s4819_s1, 9216 }
   0x2   :  { %s16_s10 = sshll.u32 %s4195_s9, 4  ;;  %p4148_p0 = scmp.ne.s32.totalorder %s4819_s1, %s4147_s13  ;;  %s17_s10 = int_to_ptr.vmem [resolvable:$true] %s16_s10 }
   0x3   :  { %p4151_p1 = scmp.lt.u32.totalorder %s4147_s13, %s4819_s1 }
   0x5   :  { %p4153_p2 = pnand %p4151_p1, %p4148_p0 }
   0x7   :  { %4156 = shalt.err (!%p4153_p2)
}
   0x8   :  { %s4157_s18 = scalar_lea.vmem %s17_s10, 9216  ;;  %p4162_p4 = scmp.lt.s32.totalorder %s17_s10, %s17_s10 }
   0x9   :  { %p4158_p3 = scmp.ne.s32.totalorder %s17_s10, %s4157_s18  ;;  %p4163_p5 = scmp.lt.s32.totalorder %s4157_s18, %s4157_s18 }
   0xb   :  { %p4164_p6 = por %p4163_p5, %p4162_p4 }
   0xd   :  { %p4165_p7 = pnand %p4164_p6, %p4158_p3 }
   0xf   :  { %4168 = shalt.err (!%p4165_p7)
}
  0x10   :  { %s4196_s19 = smov 128   ;;  %s4197_s20 = smov 8  }
  0x11   :  { %22 = dma.hbm_to_vmem [thread:$0]  %s4819_s1, 9216, %s17_s10, [#allocation3], %s4196_s19, %s4196_s19, %s4197_s20  }
  0x12   :  { %4191 = dma.done.wait [#allocation3], 9216  }
  0x13   :  { %4192 = vsyncadd [#allocation3], 4294958080  ;;  %vm111_vm0 = vcmask 261120   ;;  %v26_v0 = vld [vmem:[#allocation2] sm:$0xff]  ;;  %v27_v1 = vld [vmem:[#allocation2 + $0x8] sm:$0xff]  ;;  %vm193_vm1 = vcmask 130048  }
  0x14   :  { %v28_v2 = vld [vmem:[#allocation2 + $0x10] sm:$0xff]  ;;  %v4231_v3 = vpack.c.bf16 %v27_v1, %v26_v0  ;;  %v29_v4 = vld [vmem:[#allocation2 + $0x18] sm:$0xff]  ;;  %v4236_v5 = vld [vmem:[%s4818_s0] sm:$0xff]  ;;  %vm331_vm2 = vcmask 785408   ;;  %vm485_vm3 = vcmask 64512   ;;  %vm623_vm5 = vcmask 523264  }
  0x15   :  { %v4238_v6 = vpack.c.bf16 %v29_v4, %v28_v2  ;;  %3296 = vmatprep.mubr.msk.f32.mxu0 %vm111_vm0, %v4236_v5  ;;  %v4249_v7 = vld [vmem:[%s4818_s0 + $0x8] sm:$0xff]  ;;  %v4253_v8 = vld [vmem:[#allocation2 + $0xd0] sm:$0xff]  ;;  %v4257_v9 = vld [vmem:[#allocation2 + $0xc0] ss:$0 sm:$0xff]  ;;  %s4198_s0 = smov 120   ;;  %s4199_s26 = smov 112  }
  0x16   :  { %3704 = vmatprep.subr.bf16.mxu0 %v4231_v3  ;;  %3303 = vmatprep.mubr.msk.f32.mxu1 %vm193_vm1, %v4253_v8  ;;  %v68_v13 = vld [vmem:[#allocation2 + $0x160] sm:$0xff]  ;;  %v69_v14 = vld [vmem:[#allocation2 + $0x168] sm:$0xff]  ;;  %v70_v18 = vld [vmem:[#allocation2 + $0x170] sm:$0xff]  ;;  %vm4201_vm6 = vmmov 0   ;;  %s4203_s27 = smov [#allocation5]   ;;  %vm2908_vm7 = vcmask 9216  }
  0x17   :  { %3706 = vmatpush3.bf16.msra.mxu0 %v4231_v3  ;;  %v4261_v17 = vpack.c.bf16 %v69_v14, %v68_v13  ;;  %v71_v19 = vld [vmem:[#allocation2 + $0x178] sm:$0xff]  ;;  %v4265_v21 = vld [vmem:[#allocation2 + $0xe0] sm:$0xff]  ;;  %v73_v24 = vld [vmem:[#allocation2 + $0x188] sm:$0xff]  ;;  %s2916_s28 = sshll.u32 %s4203_s27, 4  ;;  %s2917_s28 = int_to_ptr.vmem [resolvable:$true] %s2916_s28 }
  0x18   :  { %3708 = vmatprep.subr.bf16.mxu0 %v4238_v6  ;;  %v4263_v20 = vld [vmem:[#allocation2 + $0xd8] sm:$0xff]  ;;  %v4268_v22 = vpack.c.bf16 %v71_v19, %v70_v18  ;;  %v72_v23 = vld [vmem:[#allocation2 + $0x180] sm:$0xff]  ;;  %v4274_v25 = vld [vmem:[#allocation2 + $0xe8] sm:$0xff]  ;;  %s4169_s29 = scalar_lea.vmem %s2917_s28, 32  ;;  %p4174_p9 = scmp.lt.s32.totalorder %s2917_s28, %s2917_s28 }
  0x19   :  { %v4277_v26 = vld [vmem:[#allocation2 + $0xf0] sm:$0xff]  ;;  %v4280_v27 = vpack.c.bf16 %v73_v24, %v72_v23  ;;  %v75_v29 = vld [vmem:[#allocation2 + $0x198] sm:$0xff]  ;;  %v4289_v31 = vld [vmem:[#allocation2 + $0x100] sm:$0xff]  ;;  %p4170_p8 = scmp.ne.s32.totalorder %s2917_s28, %s4169_s29  ;;  %p4175_p10 = scmp.lt.s32.totalorder %s4169_s29, %s4169_s29 }
  0x1a   :  { %v74_v28 = vld [vmem:[#allocation2 + $0x190] sm:$0xff]  ;;  %v4286_v30 = vld [vmem:[#allocation2 + $0xf8] sm:$0xff]  ;;  %v76_v33 = vld [vmem:[#allocation2 + $0x1a0] sm:$0xff] }
  0x1b   :  { %3710 = vmatpush3.bf16.msra.mxu0 %v4238_v6  ;;  %v4292_v32 = vpack.c.bf16 %v75_v29, %v74_v28  ;;  %v77_v34 = vld [vmem:[#allocation2 + $0x1a8] sm:$0xff]  ;;  %v78_v37 = vld [vmem:[#allocation2 + $0x1b0] sm:$0xff]  ;;  %v79_v38 = vld [vmem:[#allocation2 + $0x1b8] sm:$0xff]  ;;  %p4176_p11 = por %p4175_p10, %p4174_p9 }
  0x1c   :  { %v4298_v35 = vld [vmem:[#allocation2 + $0x108] sm:$0xff]  ;;  %v4302_v36 = vpack.c.bf16 %v77_v34, %v76_v33  ;;  %v4309_v39 = vpack.c.bf16 %v79_v38, %v78_v37  ;;  %v4313_v40 = vld [vmem:[#allocation2 + $0x120] sm:$0xff]  ;;  %v4318_v45 = vld [vmem:[#allocation2 + $0x138] sm:$0xff] }
  0x1d   :  { %v4315_v41 = vld [vmem:[#allocation2 + $0x128] sm:$0xff]  ;;  %v4321_v47 = vld [vmem:[#allocation2 + $0x130] sm:$0xff]  ;;  %v4329_v53 = vld [vmem:[#allocation2 + $0x140] sm:$0xff]  ;;  %p4177_p12 = pnand %p4176_p11, %p4170_p8 }
  0x1e   :  { %3297 = vmatmul.mubr.msk.f32.vlgmr.msra.gmra.mrb[0].mxu0 %vm111_vm0, %v4249_v7  ;;  %v4327_v52 = vld [vmem:[#allocation2 + $0x148] sm:$0xff]  ;;  %v4335_v58 = vld [vmem:[#allocation2 + $0x158] sm:$0xff]  ;;  %v4337_v59 = vld [vmem:[#allocation2 + $0x150] sm:$0xff] }
  0x1f   :  { %vm4364_vm4 = vmpackc.low %vm485_vm3, %vm485_vm3 }
  0xf1   :  { %v3298_v10 = vpop.f32.mrb[0].mxu0 }
  0xf2   :  { %v190_v11 = vadd.f32 %v3298_v10, %v4257_v9  ;;  %v184_v12 = vpop.f32.mrb[1].mxu0 }
  0xf3   :  { %v185_v15 = vadd.f32 %v4257_v9, %v184_v12 }
  0xf5   :  { %v3711_v16 = vpack.c.bf16 %v190_v11, %v185_v15 }
  0xf7   :  { %3712 = vmatprep.subr.bf16.mxu1 %v3711_v16 }
  0xf8   :  { %3714 = vmatpush3.bf16.msra.mxu1 %v3711_v16 }
  0xf9   :  { %3716 = vmatprep.subr.bf16.mxu1 %v4261_v17 }
  0xfb   :  { %3304 = vmatmul.mubr.msk.f32.vlgmr.msra.gmra.mrb[0].mxu1 %vm193_vm1, %v4263_v20 }
  0xfc   :  { %3306 = vmatprep.mubr.msk.f32.mxu1 %vm193_vm1, %v4265_v21  ;;  %3718 = vmatpush3.bf16.msra.mxu1 %v4261_v17 }
  0xfd   :  { %3720 = vmatprep.subr.bf16.mxu1 %v4268_v22 }
  0xff   :  { %3307 = vmatmul.mubr.msk.f32.gmra.mrb[2].mxu1 %vm193_vm1, %v4274_v25 }
 0x100   :  { %3309 = vmatprep.mubr.msk.f32.mxu1 %vm193_vm1, %v4277_v26  ;;  %3722 = vmatpush3.bf16.msra.mxu1 %v4268_v22 }
 0x101   :  { %3724 = vmatprep.subr.bf16.mxu1 %v4280_v27 }
 0x103   :  { %3310 = vmatmul.mubr.msk.f32.gmra.mrb[4].mxu1 %vm193_vm1, %v4286_v30 }
 0x104   :  { %3312 = vmatprep.mubr.msk.f32.mxu1 %vm193_vm1, %v4289_v31  ;;  %3726 = vmatpush3.bf16.msra.mxu1 %v4280_v27 }
 0x105   :  { %3728 = vmatprep.subr.bf16.mxu1 %v4292_v32 }
 0x107   :  { %3313 = vmatmul.mubr.msk.f32.gmra.mrb[6].mxu1 %vm193_vm1, %v4298_v35 }
 0x108   :  { %3730 = vmatpush3.bf16.msra.mxu1 %v4292_v32 }
 0x109   :  { %3732 = vmatprep.subr.bf16.mxu1 %v4302_v36 }
 0x10c   :  { %3734 = vmatpush3.bf16.msra.mxu1 %v4302_v36 }
 0x10d   :  { %3736 = vmatprep.subr.bf16.mxu1 %v4309_v39 }
 0x110   :  { %3738 = vmatpush3.bf16.msra.mxu1 %v4309_v39 }
 0x1ce   :  { %v3305_v42 = vpop.f32.mrb[0].mxu1 }
 0x1cf   :  { %v284_v43 = vpop.f32.mrb[1].mxu1  ;;  %v324_v46 = vmul.f32 %v3305_v42, %v4315_v41 }
 0x1d0   :  { %v323_v44 = vmul.f32 %v284_v43, %v4313_v40 }
 0x1d2   :  { %3339 = vmatprep.mubr.msk.f32.mxu1 %vm331_vm2, %v323_v44  ;;  %v3308_v48 = vpop.f32.mrb[2].mxu1 }
 0x1d3   :  { %v326_v49 = vmul.f32 %v3308_v48, %v4318_v45  ;;  %3340 = vmatmul.mubr.msk.f32.vlgmr.msra.gmra.mrb[8].mxu1 %vm331_vm2, %v324_v46  ;;  %v294_v50 = vpop.f32.mrb[3].mxu1 }
 0x1d4   :  { %v325_v51 = vmul.f32 %v294_v50, %v4321_v47 }
 0x1d6   :  { %3342 = vmatprep.mubr.msk.f32.mxu1 %vm331_vm2, %v325_v51  ;;  %v3311_v54 = vpop.f32.mrb[4].mxu1 }
 0x1d7   :  { %3343 = vmatmul.mubr.msk.f32.gmra.mrb[10].mxu1 %vm331_vm2, %v326_v49  ;;  %v328_v55 = vmul.f32 %v3311_v54, %v4327_v52  ;;  %v304_v56 = vpop.f32.mrb[5].mxu1  ;;  %v4391_v54 = vld [vmem:[#allocation2 + $0x1d0] sm:$0xff] }
 0x1d8   :  { %v327_v57 = vmul.f32 %v304_v56, %v4329_v53 }
 0x1da   :  { %3345 = vmatprep.mubr.msk.f32.mxu1 %vm331_vm2, %v327_v57  ;;  %v3314_v60 = vpop.f32.mrb[6].mxu1 }
 0x1db   :  { %3346 = vmatmul.mubr.msk.f32.gmra.mrb[12].mxu1 %vm331_vm2, %v328_v55  ;;  %v330_v61 = vmul.f32 %v3314_v60, %v4335_v58  ;;  %v314_v62 = vpop.f32.mrb[7].mxu1  ;;  %v4393_v55 = vld [vmem:[#allocation2 + $0x1c8] sm:$0xff] }
 0x1dc   :  { %v329_v63 = vmul.f32 %v314_v62, %v4337_v59 }
 0x1de   :  { %3348 = vmatprep.mubr.msk.f32.mxu1 %vm331_vm2, %v329_v63  ;;  %v4398_v63 = vld [vmem:[#allocation2 + $0x1d8] sm:$0xff] }
 0x1df   :  { %3349 = vmatmul.mubr.msk.f32.gmra.mrb[14].mxu1 %vm331_vm2, %v330_v61 }
 0x2a6   :  { %v3341_v0 = vpop.f32.mrb[8].mxu1 }
 0x2a7   :  { %v422_v1 = vpop.f32.mrb[9].mxu1 }
 0x2a8   :  { %v4345_v2 = vpack.i.bf16 %v3341_v0, %v422_v1  ;;  %3367 = vmatprep.mubr.msk.f32.mxu0 %vm485_vm3, %v422_v1 }
 0x2aa   :  { %3980 = vrot.lane.b32.xlu0 %v4345_v2, %s4198_s0  ;;  %v3344_v4 = vpop.f32.mrb[10].mxu1 }
 0x2ab   :  { %v432_v10 = vpop.f32.mrb[11].mxu1 }
 0x2ac   :  { %v4350_v11 = vpack.i.bf16 %v3344_v4, %v432_v10 }
 0x2ae   :  { %3985 = vrot.lane.b32.xlu0 %v4350_v11, %s4198_s0  ;;  %v3347_v12 = vpop.f32.mrb[12].mxu1 }
 0x2af   :  { %v442_v13 = vpop.f32.mrb[13].mxu1 }
 0x2b0   :  { %v4354_v14 = vpack.i.bf16 %v3347_v12, %v442_v13 }
 0x2b2   :  { %3990 = vrot.lane.b32.xlu1 %v4354_v14, %s4198_s0  ;;  %v3350_v15 = vpop.f32.mrb[14].mxu1 }
 0x2b3   :  { %v452_v16 = vpop.f32.mrb[15].mxu1 }
 0x2b4   :  { %v4358_v18 = vpack.i.bf16 %v3350_v15, %v452_v16 }
 0x2b6   :  { %3995 = vrot.lane.b32.xlu1 %v4358_v18, %s4198_s0 }
 0x31c   :  { %v3981_v19 = vpop.permute.xlu0 %3980 }
 0x31d   :  { %v3983_v23 = vunpack.i.h.bf16 %v3981_v19  ;;  %v3982_v24 = vunpack.i.l.bf16 %v3981_v19 }
 0x31f   :  { %v3739_v29 = vpack.c.bf16 %v3983_v23, %v3982_v24  ;;  %v4408_v23 = vld [vmem:[#allocation2 + $0x1f0] sm:$0xff] }
 0x320   :  { %v3986_v33 = vpop.permute.xlu0 %3985 }
 0x321   :  { %3741 = vmatprep.subr.msk.bf16.mxu0 %vm4364_vm4, %v3739_v29  ;;  %v3988_v34 = vunpack.i.h.bf16 %v3986_v33  ;;  %v3987_v37 = vunpack.i.l.bf16 %v3986_v33  ;;  %v4411_v33 = vld [vmem:[#allocation2 + $0x1f8] sm:$0xff] }
 0x322   :  { %3744 = vmatpush3.bf16.xpose.msk.msra.mxu0 %vm4364_vm4, %v3739_v29 }
 0x323   :  { %v3745_v38 = vpack.c.bf16 %v3988_v34, %v3987_v37 }
 0x324   :  { %v3991_v42 = vpop.permute.xlu1 %3990 }
 0x325   :  { %3747 = vmatprep.subr.msk.bf16.mxu0 %vm4364_vm4, %v3745_v38  ;;  %v3993_v43 = vunpack.i.h.bf16 %v3991_v42  ;;  %v3992_v44 = vunpack.i.l.bf16 %v3991_v42 }
 0x327   :  { %v3751_v46 = vpack.c.bf16 %v3993_v43, %v3992_v44  ;;  %v4416_v43 = vld [vmem:[#allocation2 + $0x200] sm:$0xff] }
 0x328   :  { %v3996_v48 = vpop.permute.xlu1 %3995  ;;  %4826 = vst [vmem:[#allocation8_spill] sm:$0xff] %v4416_v43 }
 0x329   :  { %v3998_v49 = vunpack.i.h.bf16 %v3996_v48  ;;  %v3997_v50 = vunpack.i.l.bf16 %v3996_v48 }
 0x32a   :  { %3750 = vmatpush3.bf16.xpose.msk.msra.mxu0 %vm4364_vm4, %v3745_v38 }
 0x32b   :  { %3753 = vmatprep.subr.msk.bf16.mxu0 %vm4364_vm4, %v3751_v46  ;;  %v3757_v51 = vpack.c.bf16 %v3998_v49, %v3997_v50 }
 0x332   :  { %3756 = vmatpush3.bf16.xpose.msk.msra.mxu0 %vm4364_vm4, %v3751_v46 }
 0x333   :  { %3759 = vmatprep.subr.msk.bf16.mxu0 %vm4364_vm4, %v3757_v51 }
 0x33a   :  { %3762 = vmatpush3.bf16.xpose.msk.msra.mxu0 %vm4364_vm4, %v3757_v51 }
 0x341   :  { %3368 = vmatmul.mubr.msk.f32.vlgmr.msra.gmra.mrb[2].mxu0 %vm485_vm3, %v3341_v0 }
 0x342   :  { %3370 = vmatprep.mubr.msk.f32.mxu0 %vm485_vm3, %v432_v10 }
 0x345   :  { %3371 = vmatmul.mubr.msk.f32.gmra.mrb[4].mxu0 %vm485_vm3, %v3344_v4  ;;  %v4401_v4 = vld [vmem:[#allocation2 + $0x1e0] sm:$0xff] }
 0x346   :  { %3373 = vmatprep.mubr.msk.f32.mxu0 %vm485_vm3, %v442_v13  ;;  %v4404_v13 = vld [vmem:[#allocation2 + $0x1e8] sm:$0xff] }
 0x349   :  { %3374 = vmatmul.mubr.msk.f32.gmra.mrb[6].mxu0 %vm485_vm3, %v3347_v12 }
 0x34a   :  { %3376 = vmatprep.mubr.msk.f32.mxu0 %vm485_vm3, %v452_v16 }
 0x34d   :  { %3377 = vmatmul.mubr.msk.f32.gmra.mrb[8].mxu0 %vm485_vm3, %v3350_v15 }
 0x414   :  { %v3369_v56 = vpop.f32.mrb[2].mxu0 }
 0x415   :  { %v590_v57 = vadd.f32 %v3369_v56, %v4391_v54  ;;  %v584_v60 = vpop.f32.mrb[3].mxu0 }
 0x416   :  { %v585_v61 = vadd.f32 %v584_v60, %v4393_v55 }
 0x417   :  { %v627_v62 = vsel %vm623_vm5, %v590_v57, -inf }
 0x418   :  { %628 = vmax.xlane.f32.xlu1 %v627_v62  ;;  %v3372_v0 = vpop.f32.mrb[4].mxu0  ;;  %v624_v1 = vsel %vm623_vm5, %v585_v61, -inf }
 0x419   :  { %v594_v10 = vpop.f32.mrb[5].mxu0  ;;  %625 = vmax.xlane.f32.xlu0 %v624_v1  ;;  %v600_v15 = vadd.f32 %v3372_v0, %v4401_v4 }
 0x41a   :  { %v595_v12 = vadd.f32 %v594_v10, %v4398_v63 }
 0x41b   :  { %v633_v42 = vsel %vm623_vm5, %v600_v15, -inf }
 0x41c   :  { %v3375_v16 = vpop.f32.mrb[6].mxu0  ;;  %v630_v19 = vsel %vm623_vm5, %v595_v12, -inf }
 0x41d   :  { %v604_v24 = vpop.f32.mrb[7].mxu0  ;;  %631 = vmax.xlane.f32.xlu0 %v630_v19  ;;  %v610_v34 = vadd.f32 %v3375_v16, %v4408_v23 }
 0x41e   :  { %v605_v29 = vadd.f32 %v604_v24, %v4404_v13 }
 0x41f   :  { %v639_v50 = vsel %vm623_vm5, %v610_v34, -inf }
 0x420   :  { %v3378_v37 = vpop.f32.mrb[8].mxu0  ;;  %v636_v38 = vsel %vm623_vm5, %v605_v29, -inf }
 0x421   :  { %v614_v44 = vpop.f32.mrb[9].mxu0  ;;  %637 = vmax.xlane.f32.xlu1 %v636_v38  ;;  %634 = vmax.xlane.f32.xlu0 %v633_v42  ;;  %v620_v48 = vadd.f32 %v3378_v37, %v4416_v43 }
 0x422   :  { %v615_v46 = vadd.f32 %v614_v44, %v4411_v33 }
 0x423   :  { %v645_v51 = vsel %vm623_vm5, %v620_v48, -inf }
 0x424   :  { %v642_v49 = vsel %vm623_vm5, %v615_v46, -inf }
 0x425   :  { %643 = vmax.xlane.f32.xlu1 %v642_v49  ;;  %640 = vmax.xlane.f32.xlu0 %v639_v50 }
 0x429   :  { %646 = vmax.xlane.f32.xlu0 %v645_v51 }
 0x436   :  { %4000 = vrot.lane.b32.xlu1 %v4345_v2, %s4199_s26 }
 0x4a5   :  { %v629_v56 = vpop.xlane.xlu1 %628 }
 0x4a6   :  { %v649_v60 = vsub.f32 %v590_v57, %v629_v56  ;;  %v626_v62 = vpop.xlane.xlu0 %625 }
 0x4a7   :  { %v648_v0 = vsub.f32 %v585_v61, %v626_v62 }
 0x4a8   :  { %v658_v1 = vmul.f32 1.442695, %v649_v60 }
 0x4a9   :  { %v656_v10 = vmul.f32 1.442695, %v648_v0 }
 0x4aa   :  { %4059 = vpow2.f32 %v658_v1  ;;  %v632_v16 = vpop.xlane.xlu0 %631 }
 0x4ab   :  { %4061 = vpow2.f32 %v656_v10  ;;  %v650_v19 = vsub.f32 %v595_v12, %v632_v16 }
 0x4ad   :  { %v660_v24 = vmul.f32 1.442695, %v650_v19 }
 0x4ae   :  { %v638_v37 = vpop.xlane.xlu1 %637  ;;  %v635_v38 = vpop.xlane.xlu0 %634 }
 0x4af   :  { %4063 = vpow2.f32 %v660_v24  ;;  %v652_v42 = vsub.f32 %v605_v29, %v638_v37  ;;  %v651_v44 = vsub.f32 %v600_v15, %v635_v38 }
 0x4b1   :  { %v664_v49 = vmul.f32 1.442695, %v652_v42  ;;  %v662_v50 = vmul.f32 1.442695, %v651_v44 }
 0x4b2   :  { %v644_v51 = vpop.xlane.xlu1 %643  ;;  %v641_v2 = vpop.xlane.xlu0 %640 }
 0x4b3   :  { %4065 = vpow2.f32 %v664_v49  ;;  %v653_v57 = vsub.f32 %v610_v34, %v641_v2  ;;  %v654_v62 = vsub.f32 %v615_v46, %v644_v51 }
 0x4b4   :  { %v4425_v56 = vpop.eup %4059  ;;  %4067 = vpow2.f32 %v662_v50 }
 0x4b5   :  { %v4062_v61 = vpop.eup %4061  ;;  %v666_v60 = vmul.f32 1.442695, %v653_v57  ;;  %v675_v12 = vsel %vm623_vm5, %v4425_v56, 0.0  ;;  %v668_v37 = vmul.f32 1.442695, %v654_v62 }
 0x4b6   :  { %v4001_v0 = vpop.permute.xlu1 %4000  ;;  %676 = vadd.xlane.f32.xlu0 %v675_v12  ;;  %v647_v1 = vpop.xlane.xlu0 %646  ;;  %v672_v15 = vsel %vm623_vm5, %v4062_v61, 0.0  ;;  %v4460_v12 = vld [vmem:[#allocation2 + $0x1c0] sm:$0xff] }
 0x4b7   :  { %v4003_v29 = vunpack.i.h.bf16 %v4001_v0  ;;  %v4002_v10 = vunpack.i.l.bf16 %v4001_v0  ;;  %v655_v16 = vsub.f32 %v620_v48, %v647_v1  ;;  %673 = vadd.xlane.f32.xlu1 %v672_v15  ;;  %4069 = vpow2.f32 %v666_v60  ;;  %3407 = vmatprep.subr.mxu0 %v4460_v12 }
 0x4b8   :  { %3408 = vmatpush3.msra.mxu0 %v4460_v12 }
 0x4b9   :  { %v4430_v34 = vpop.eup %4063  ;;  %v3763_v19 = vpack.c.bf16 %v4003_v29, %v4002_v10  ;;  %v670_v24 = vmul.f32 1.442695, %v655_v16 }
 0x4ba   :  { %v678_v38 = vsel %vm623_vm5, %v4430_v34, 0.0 }
 0x4bb   :  { %4071 = vpow2.f32 %v670_v24  ;;  %3764 = vmatprep.subr.bf16.mxu1 %v3763_v19  ;;  %679 = vadd.xlane.f32.xlu1 %v678_v38 }
 0x4bc   :  { %3766 = vmatpush3.bf16.msra.mxu1 %v3763_v19  ;;  %4073 = vpow2.f32 %v668_v37 }
 0x4bd   :  { %v4434_v46 = vpop.eup %4065 }
 0x4be   :  { %v4436_v42 = vpop.eup %4067  ;;  %v684_v48 = vsel %vm623_vm5, %v4434_v46, 0.0 }
 0x4bf   :  { %685 = vadd.xlane.f32.xlu1 %v684_v48  ;;  %v681_v44 = vsel %vm623_vm5, %v4436_v42, 0.0 }
 0x4c0   :  { %682 = vadd.xlane.f32.xlu0 %v681_v44 }
 0x4c1   :  { %v4442_v49 = vpop.eup %4069 }
 0x4c2   :  { %v687_v50 = vsel %vm623_vm5, %v4442_v49, 0.0 }
 0x4c4   :  { %688 = vadd.xlane.f32.xlu0 %v687_v50 }
 0x4c5   :  { %v4446_v51 = vpop.eup %4071 }
 0x4c6   :  { %v693_v2 = vsel %vm623_vm5, %v4446_v51, 0.0  ;;  %v4450_v57 = vpop.eup %4073 }
 0x4c7   :  { %v690_v60 = vsel %vm623_vm5, %v4450_v57, 0.0 }
 0x4c8   :  { %694 = vadd.xlane.f32.xlu0 %v693_v2 }
 0x4cc   :  { %691 = vadd.xlane.f32.xlu0 %v690_v60 }
 0x4d0   :  { %4010 = vrot.lane.b32.xlu1 %v4354_v14, %s4199_s26 }
 0x4d4   :  { %4015 = vrot.lane.b32.xlu1 %v4358_v18, %s4199_s26 }
 0x4e2   :  { %4005 = vrot.lane.b32.xlu0 %v4350_v11, %s4199_s26 }
 0x543   :  { %v677_v0 = vpop.xlane.xlu0 %676 }
 0x544   :  { %v674_v62 = vpop.xlane.xlu1 %673 }
 0x545   :  { %4075 = vrcp.f32 %v674_v62 }
 0x546   :  { %4077 = vrcp.f32 %v677_v0 }
 0x548   :  { %v680_v1 = vpop.xlane.xlu1 %679 }
 0x549   :  { %4079 = vrcp.f32 %v680_v1 }
 0x54c   :  { %v686_v18 = vpop.xlane.xlu1 %685 }
 0x54d   :  { %v683_v15 = vpop.xlane.xlu0 %682 }
 0x54e   :  { %4081 = vrcp.f32 %v683_v15 }
 0x54f   :  { %v4076_v29 = vpop.eup %4075  ;;  %4083 = vrcp.f32 %v686_v18 }
 0x550   :  { %v704_v10 = vmul.f32 %v4076_v29, %v4062_v61  ;;  %v4011_v19 = vpop.permute.xlu1 %4010  ;;  %v4078_v29 = vpop.eup %4077 }
 0x551   :  { %v689_v14 = vpop.xlane.xlu0 %688  ;;  %v4013_v37 = vunpack.i.h.bf16 %v4011_v19  ;;  %v4012_v38 = vunpack.i.l.bf16 %v4011_v19  ;;  %v705_v0 = vmul.f32 %v4078_v29, %v4425_v56 }
 0x552   :  { %3395 = vmatprep.mubr.msk.f32.mxu1 %vm623_vm5, %v704_v10  ;;  %4085 = vrcp.f32 %v689_v14 }
 0x553   :  { %v3771_v60 = vpack.c.bf16 %v4013_v37, %v4012_v38  ;;  %v4080_v10 = vpop.eup %4079 }
 0x554   :  { %v4016_v50 = vpop.permute.xlu1 %4015  ;;  %v706_v19 = vmul.f32 %v4080_v10, %v4430_v34 }
 0x555   :  { %v695_v16 = vpop.xlane.xlu0 %694  ;;  %v4018_v62 = vunpack.i.h.bf16 %v4016_v50  ;;  %v4017_v43 = vunpack.i.l.bf16 %v4016_v50 }
 0x557   :  { %v3775_v61 = vpack.c.bf16 %v4018_v62, %v4017_v43 }
 0x558   :  { %v4082_v1 = vpop.eup %4081 }
 0x559   :  { %v692_v11 = vpop.xlane.xlu0 %691  ;;  %v707_v43 = vmul.f32 %v4082_v1, %v4436_v42 }
 0x55a   :  { %4087 = vrcp.f32 %v692_v11 }
 0x55b   :  { %4089 = vrcp.f32 %v695_v16 }
 0x55d   :  { %v4006_v24 = vpop.permute.xlu0 %4005 }
 0x55e   :  { %v4008_v48 = vunpack.i.h.bf16 %v4006_v24  ;;  %v4007_v44 = vunpack.i.l.bf16 %v4006_v24  ;;  %v4084_v24 = vpop.eup %4083 }
 0x55f   :  { %v4086_v15 = vpop.eup %4085  ;;  %v708_v14 = vmul.f32 %v4084_v24, %v4434_v46 }
 0x560   :  { %v3767_v2 = vpack.c.bf16 %v4008_v48, %v4007_v44  ;;  %v709_v56 = vmul.f32 %v4086_v15, %v4442_v49  ;;  %v4487_v44 = vld [vmem:[#allocation2 + $0x110] sm:$0xff] }
 0x562   :  { %3768 = vmatprep.subr.bf16.mxu1 %v3767_v2 }
 0x563   :  { %3770 = vmatpush3.bf16.msra.mxu1 %v3767_v2 }
 0x564   :  { %3772 = vmatprep.subr.bf16.mxu1 %v3771_v60  ;;  %v4088_v18 = vpop.eup %4087 }
 0x565   :  { %v4090_v16 = vpop.eup %4089  ;;  %v710_v34 = vmul.f32 %v4088_v18, %v4450_v57 }
 0x566   :  { %v711_v11 = vmul.f32 %v4090_v16, %v4446_v51 }
 0x567   :  { %3774 = vmatpush3.bf16.msra.mxu1 %v3771_v60 }
 0x568   :  { %3776 = vmatprep.subr.bf16.mxu1 %v3775_v61 }
 0x56b   :  { %3778 = vmatpush3.bf16.msra.mxu1 %v3775_v61 }
 0x56e   :  { %3396 = vmatmul.mubr.msk.f32.vlgmr.msra.gmra.mrb[16].mxu1 %vm623_vm5, %v705_v0 }
 0x56f   :  { %3398 = vmatprep.mubr.msk.f32.mxu1 %vm623_vm5, %v706_v19 }
 0x572   :  { %3399 = vmatmul.mubr.msk.f32.gmra.mrb[18].mxu1 %vm623_vm5, %v707_v43 }
 0x573   :  { %3401 = vmatprep.mubr.msk.f32.mxu1 %vm623_vm5, %v708_v14 }
 0x576   :  { %3402 = vmatmul.mubr.msk.f32.gmra.mrb[20].mxu1 %vm623_vm5, %v709_v56 }
 0x577   :  { %3404 = vmatprep.mubr.msk.f32.mxu1 %vm623_vm5, %v710_v34 }
 0x57a   :  { %3405 = vmatmul.mubr.msk.f32.gmra.mrb[22].mxu1 %vm623_vm5, %v711_v11  ;;  %v30_v11 = vld [vmem:[#allocation2 + $0x20] sm:$0xff] }
 0x57b   :  { %3437 = vmatprep.mubr.msk.f32.mxu1 %vm623_vm5, %v4487_v44 }
 0x641   :  { %v3397_v42 = vpop.f32.mrb[16].mxu1 }
 0x642   :  { %v826_v46 = vpop.f32.mrb[17].mxu1 }
 0x643   :  { %3409 = vmatprep.mubr.msk.f32.mxu0 %vm485_vm3, %v826_v46 }
 0x644   :  { %3410 = vmatmul.mubr.msk.f32.vlgmr.msra.gmra.mrb[10].mxu0 %vm485_vm3, %v3397_v42  ;;  %v31_v42 = vld [vmem:[#allocation2 + $0x28] sm:$0xff] }
 0x645   :  { %v3400_v37 = vpop.f32.mrb[18].mxu1 }
 0x646   :  { %v836_v38 = vpop.f32.mrb[19].mxu1 }
 0x647   :  { %3412 = vmatprep.mubr.msk.f32.mxu0 %vm485_vm3, %v836_v38  ;;  %v4499_v38 = vpack.c.bf16 %v31_v42, %v30_v11 }
 0x648   :  { %3413 = vmatmul.mubr.msk.f32.gmra.mrb[12].mxu0 %vm485_vm3, %v3400_v37 }
 0x649   :  { %v3403_v49 = vpop.f32.mrb[20].mxu1 }
 0x64a   :  { %v846_v57 = vpop.f32.mrb[21].mxu1 }
 0x64b   :  { %3415 = vmatprep.mubr.msk.f32.mxu0 %vm485_vm3, %v846_v57  ;;  %v33_v57 = vld [vmem:[#allocation2 + $0x38] sm:$0xff] }
 0x64c   :  { %3416 = vmatmul.mubr.msk.f32.gmra.mrb[14].mxu0 %vm485_vm3, %v3403_v49  ;;  %v32_v49 = vld [vmem:[#allocation2 + $0x30] sm:$0xff] }
 0x64d   :  { %v3406_v51 = vpop.f32.mrb[22].mxu1 }
 0x64e   :  { %v856_v48 = vpop.f32.mrb[23].mxu1 }
 0x64f   :  { %3418 = vmatprep.mubr.msk.f32.mxu0 %vm485_vm3, %v856_v48  ;;  %v4504_v48 = vpack.c.bf16 %v33_v57, %v32_v49  ;;  %v36_v49 = vld [vmem:[#allocation2 + $0x50] sm:$0xff]  ;;  %v37_v57 = vld [vmem:[#allocation2 + $0x58] sm:$0xff] }
 0x650   :  { %3419 = vmatmul.mubr.msk.f32.gmra.mrb[16].mxu0 %vm485_vm3, %v3406_v51  ;;  %v4501_v51 = vld [vmem:[#allocation2 + $0x118] sm:$0xff] }
 0x717   :  { %v3411_v50 = vpop.f32.mrb[10].mxu0 }
 0x718   :  { %v995_v2 = vmul.f32 %v3411_v50, %v4315_v41  ;;  %v955_v60 = vpop.f32.mrb[11].mxu0 }
 0x719   :  { %v994_v62 = vmul.f32 %v955_v60, %v4313_v40  ;;  %v4513_v60 = vld [vmem:[#allocation2 + $0xc1] ss:$0 sm:$0xff] }
 0x71b   :  { %v3779_v61 = vpack.c.bf16 %v995_v2, %v994_v62  ;;  %v3414_v29 = vpop.f32.mrb[12].mxu0 }
 0x71c   :  { %v997_v10 = vmul.f32 %v3414_v29, %v4318_v45  ;;  %v965_v0 = vpop.f32.mrb[13].mxu0 }
 0x71d   :  { %v996_v1 = vmul.f32 %v965_v0, %v4321_v47  ;;  %3780 = vmatprep.subr.bf16.mxu1 %v3779_v61 }
 0x71e   :  { %3782 = vmatpush3.bf16.msra.mxu1 %v3779_v61 }
 0x71f   :  { %v3783_v19 = vpack.c.bf16 %v997_v10, %v996_v1  ;;  %v3417_v24 = vpop.f32.mrb[14].mxu0 }
 0x720   :  { %v999_v43 = vmul.f32 %v3417_v24, %v4327_v52  ;;  %v975_v15 = vpop.f32.mrb[15].mxu0 }
 0x721   :  { %v998_v14 = vmul.f32 %v975_v15, %v4329_v53  ;;  %3784 = vmatprep.subr.bf16.mxu1 %v3783_v19 }
 0x722   :  { %3786 = vmatpush3.bf16.msra.mxu1 %v3783_v19 }
 0x723   :  { %v3787_v18 = vpack.c.bf16 %v999_v43, %v998_v14  ;;  %v3420_v56 = vpop.f32.mrb[16].mxu0 }
 0x724   :  { %v1001_v16 = vmul.f32 %v3420_v56, %v4335_v58  ;;  %v985_v34 = vpop.f32.mrb[17].mxu0 }
 0x725   :  { %v1000_v46 = vmul.f32 %v985_v34, %v4337_v59  ;;  %3788 = vmatprep.subr.bf16.mxu1 %v3787_v18 }
 0x726   :  { %3790 = vmatpush3.bf16.msra.mxu1 %v3787_v18 }
 0x727   :  { %v3791_v37 = vpack.c.bf16 %v1001_v16, %v1000_v46  ;;  %v35_v46 = vld [vmem:[#allocation2 + $0x48] sm:$0xff] }
 0x729   :  { %3792 = vmatprep.subr.bf16.mxu1 %v3791_v37 }
 0x72a   :  { %3794 = vmatpush3.bf16.msra.mxu1 %v3791_v37 }
 0x72b   :  { %3796 = vmatprep.subr.bf16.mxu1 %v4499_v38 }
 0x72d   :  { %3438 = vmatmul.mubr.msk.f32.vlgmr.msra.gmra.mrb[24].mxu1 %vm623_vm5, %v4501_v51 }
 0x72e   :  { %3798 = vmatpush3.bf16.msra.mxu1 %v4499_v38 }
 0x72f   :  { %3800 = vmatprep.subr.bf16.mxu1 %v4504_v48 }
 0x732   :  { %3802 = vmatpush3.bf16.msra.mxu1 %v4504_v48 }
 0x800   :  { %v3439_v50 = vpop.f32.mrb[24].mxu1 }
 0x801   :  { %v1074_v2 = vpop.f32.mrb[25].mxu1 }
 0x802   :  { %3448 = vmatprep.mubr.msk.f32.mxu1 %vm111_vm0, %v1074_v2  ;;  %v38_v2 = vld [vmem:[#allocation2 + $0x60] sm:$0xff] }
 0x803   :  { %3449 = vmatmul.mubr.msk.f32.vlgmr.msra.gmra.mrb[26].mxu1 %vm111_vm0, %v3439_v50  ;;  %v4527_v50 = vpack.c.bf16 %v37_v57, %v36_v49  ;;  %v4546_v57 = vld [vmem:[#allocation2 + $0xc3] ss:$0 sm:$0xff] }
 0x8d6   :  { %v3450_v62 = vpop.f32.mrb[26].mxu1 }
 0x8d7   :  { %v1165_v61 = vadd.f32 %v3450_v62, %v4513_v60  ;;  %v1159_v29 = vpop.f32.mrb[27].mxu1  ;;  %v39_v62 = vld [vmem:[#allocation2 + $0x68] sm:$0xff] }
 0x8d8   :  { %v1160_v10 = vadd.f32 %v4513_v60, %v1159_v29  ;;  %v4532_v29 = vpack.c.bf16 %v39_v62, %v38_v2 }
 0x8d9   :  { %v1169_v0 = vadd.f32 %v1165_v61, %v4249_v7  ;;  %v40_v61 = vld [vmem:[#allocation2 + $0x70] sm:$0xff] }
 0x8da   :  { %v1168_v1 = vadd.f32 %v1160_v10, %v4236_v5  ;;  %v34_v5 = vld [vmem:[#allocation2 + $0x40] sm:$0xff]  ;;  %v41_v10 = vld [vmem:[#allocation2 + $0x78] sm:$0xff]  ;;  %3812 = vmatprep.subr.bf16.mxu1 %v4532_v29 }
 0x8db   :  { %v1173_v19 = vsel %vm111_vm0, %v1169_v0, 0.0  ;;  %v4523_v37 = vpack.c.bf16 %v35_v46, %v34_v5  ;;  %3814 = vmatpush3.bf16.msra.mxu1 %v4532_v29 }
 0x8dc   :  { %1174 = vadd.xlane.f32.xlu0 %v1173_v19  ;;  %v1170_v24 = vsel %vm111_vm0, %v1168_v1, 0.0  ;;  %v43_v19 = vld [vmem:[#allocation2 + $0x88] sm:$0xff] }
 0x8dd   :  { %1171 = vadd.xlane.f32.xlu1 %v1170_v24  ;;  %3804 = vmatprep.subr.bf16.mxu0 %v4523_v37 }
 0x8de   :  { %3806 = vmatpush3.bf16.msra.mxu0 %v4523_v37 }
 0x8df   :  { %3808 = vmatprep.subr.bf16.mxu0 %v4527_v50 }
 0x8e2   :  { %3810 = vmatpush3.bf16.msra.mxu0 %v4527_v50 }
 0x8e3   :  { %3828 = vmatprep.subr.bf16.mxu0 %v4231_v3 }
 0x969   :  { %v1175_v43 = vpop.xlane.xlu0 %1174 }
 0x96a   :  { %v1178_v15 = vmul.f32 0.03125, %v1175_v43  ;;  %v1172_v14 = vpop.xlane.xlu1 %1171 }
 0x96b   :  { %v1177_v18 = vmul.f32 0.03125, %v1172_v14 }
 0x96c   :  { %v1180_v56 = vsub.f32 %v1169_v0, %v1178_v15  ;;  %v4534_v0 = vpack.c.bf16 %v41_v10, %v40_v61 }
 0x96d   :  { %v1179_v16 = vsub.f32 %v1168_v1, %v1177_v18  ;;  %v42_v1 = vld [vmem:[#allocation2 + $0x80] sm:$0xff] }
 0x96e   :  { %v1182_v34 = vmul.f32 %v1180_v56, %v1180_v56  ;;  %3816 = vmatprep.subr.bf16.mxu1 %v4534_v0  ;;  %v4539_v24 = vpack.c.bf16 %v43_v19, %v42_v1  ;;  %v4561_v19 = vld [vmem:[#allocation2 + $0xc4] ss:$0 sm:$0xff] }
 0x96f   :  { %v1181_v11 = vmul.f32 %v1179_v16, %v1179_v16  ;;  %3818 = vmatpush3.bf16.msra.mxu1 %v4534_v0  ;;  %4827 = vst [vmem:[#allocation9_spill] sm:$0xff] %v4561_v19 }
 0x970   :  { %v1186_v42 = vsel %vm111_vm0, %v1182_v34, 0.0  ;;  %3820 = vmatprep.subr.bf16.mxu1 %v4539_v24 }
 0x971   :  { %1187 = vadd.xlane.f32.xlu0 %v1186_v42  ;;  %v1183_v7 = vsel %vm111_vm0, %v1181_v11, 0.0 }
 0x972   :  { %1184 = vadd.xlane.f32.xlu1 %v1183_v7  ;;  %v4544_v7 = vld [vmem:[#allocation2 + $0xc2] ss:$0 sm:$0xff] }
 0x973   :  { %3822 = vmatpush3.bf16.msra.mxu1 %v4539_v24 }
 0x9fe   :  { %v1188_v43 = vpop.xlane.xlu0 %1187 }
 0x9ff   :  { %v1190_v15 = vmul.f32 0.03125, %v1188_v43  ;;  %v1185_v14 = vpop.xlane.xlu1 %1184 }
 0xa00   :  { %v1189_v18 = vmul.f32 0.03125, %v1185_v14 }
 0xa01   :  { %v1192_v34 = vadd.f32 1e-05, %v1190_v15 }
 0xa02   :  { %v1191_v11 = vadd.f32 1e-05, %v1189_v18 }
 0xa03   :  { %4091 = vrsqrt.f32 %v1192_v34 }
 0xa04   :  { %4093 = vrsqrt.f32 %v1191_v11 }
 0xa0d   :  { %v4092_v42 = vpop.eup %4091 }
 0xa0e   :  { %v4094_v5 = vpop.eup %4093  ;;  %v1196_v46 = vmul.f32 %v4092_v42, %v1180_v56  ;;  %v44_v56 = vld [vmem:[#allocation2 + $0x90] sm:$0xff] }
 0xa0f   :  { %v1195_v49 = vmul.f32 %v4094_v5, %v1179_v16  ;;  %v45_v16 = vld [vmem:[#allocation2 + $0x98] sm:$0xff] }
 0xa10   :  { %v1202_v2 = vmul.f32 %v4544_v7, %v1196_v46  ;;  %v4557_v1 = vpack.c.bf16 %v45_v16, %v44_v56 }
 0xa11   :  { %v1201_v62 = vmul.f32 %v4544_v7, %v1195_v49 }
 0xa12   :  { %v1208_v10 = vadd.f32 %v4546_v57, %v1202_v2  ;;  %3824 = vmatprep.subr.bf16.mxu1 %v4557_v1 }
 0xa13   :  { %v1207_v61 = vadd.f32 %v4546_v57, %v1201_v62  ;;  %3826 = vmatpush3.bf16.msra.mxu1 %v4557_v1 }
 0xa15   :  { %3459 = vmatprep.mubr.msk.f32.mxu0 %vm111_vm0, %v1207_v61 }
 0xa16   :  { %3460 = vmatmul.mubr.msk.f32.vlgmr.msra.gmra.mrb[18].mxu0 %vm111_vm0, %v1208_v10 }
 0xa17   :  { %3830 = vmatpush3.bf16.msra.mxu0 %v4231_v3 }
 0xa18   :  { %3832 = vmatprep.subr.bf16.mxu0 %v4238_v6 }
 0xa1b   :  { %3834 = vmatpush3.bf16.msra.mxu0 %v4238_v6  ;;  %v4567_v6 = vld [vmem:[#allocation2 + $0xc5] ss:$0 sm:$0xff] }
 0xae9   :  { %v3461_v43 = vpop.f32.mrb[18].mxu0 }
 0xaea   :  { %v1291_v15 = vadd.f32 %v3461_v43, %v4561_v19  ;;  %v1285_v14 = vpop.f32.mrb[19].mxu0 }
 0xaeb   :  { %v1286_v3 = vadd.f32 %v4561_v19, %v1285_v14 }
 0xaec   :  { %v1295_v34 = vmax.f32 %v1291_v15, 0.0 }
 0xaed   :  { %v1294_v18 = vmax.f32 %v1286_v3, 0.0 }
 0xaef   :  { %3478 = vmatprep.mubr.msk.f32.mxu1 %vm623_vm5, %v1294_v18 }
 0xaf0   :  { %3479 = vmatmul.mubr.msk.f32.vlgmr.msra.gmra.mrb[28].mxu1 %vm623_vm5, %v1295_v34 }
 0xbc3   :  { %v3480_v11 = vpop.f32.mrb[28].mxu1 }
 0xbc4   :  { %v1378_v42 = vadd.f32 %v3480_v11, %v4567_v6  ;;  %v1372_v5 = vpop.f32.mrb[29].mxu1 }
 0xbc5   :  { %v1373_v46 = vadd.f32 %v4567_v6, %v1372_v5 }
 0xbc6   :  { %v1382_v49 = vadd.f32 %v1378_v42, %v1208_v10 }
 0xbc7   :  { %v1381_v2 = vadd.f32 %v1373_v46, %v1207_v61 }
 0xbc8   :  { %v1386_v62 = vsel %vm111_vm0, %v1382_v49, 0.0 }
 0xbc9   :  { %1387 = vadd.xlane.f32.xlu0 %v1386_v62  ;;  %v1383_v56 = vsel %vm111_vm0, %v1381_v2, 0.0 }
 0xbca   :  { %1384 = vadd.xlane.f32.xlu1 %v1383_v56 }
 0xc56   :  { %v1388_v16 = vpop.xlane.xlu0 %1387 }
 0xc57   :  { %v1390_v43 = vmul.f32 0.03125, %v1388_v16  ;;  %v1385_v15 = vpop.xlane.xlu1 %1384 }
 0xc58   :  { %v1389_v14 = vmul.f32 0.03125, %v1385_v15  ;;  %v4575_v15 = vld [vmem:[#allocation2 + $0xc6] ss:$0 sm:$0xff] }
 0xc59   :  { %v1392_v3 = vsub.f32 %v1382_v49, %v1390_v43 }
 0xc5a   :  { %v1391_v18 = vsub.f32 %v1381_v2, %v1389_v14  ;;  %v4577_v14 = vld [vmem:[#allocation2 + $0xc7] ss:$0 sm:$0xff] }
 0xc5b   :  { %v1394_v34 = vmul.f32 %v1392_v3, %v1392_v3 }
 0xc5c   :  { %v1393_v19 = vmul.f32 %v1391_v18, %v1391_v18 }
 0xc5d   :  { %v1398_v11 = vsel %vm111_vm0, %v1394_v34, 0.0 }
 0xc5e   :  { %1399 = vadd.xlane.f32.xlu0 %v1398_v11  ;;  %v1395_v10 = vsel %vm111_vm0, %v1393_v19, 0.0 }
 0xc5f   :  { %1396 = vadd.xlane.f32.xlu1 %v1395_v10 }
 0xceb   :  { %v1400_v61 = vpop.xlane.xlu0 %1399 }
 0xcec   :  { %v1402_v42 = vmul.f32 0.03125, %v1400_v61  ;;  %v1397_v5 = vpop.xlane.xlu1 %1396 }
 0xced   :  { %v1401_v46 = vmul.f32 0.03125, %v1397_v5 }
 0xcee   :  { %v1404_v62 = vadd.f32 1e-05, %v1402_v42 }
 0xcef   :  { %v1403_v56 = vadd.f32 1e-05, %v1401_v46 }
 0xcf0   :  { %4095 = vrsqrt.f32 %v1404_v62 }
 0xcf1   :  { %4097 = vrsqrt.f32 %v1403_v56 }
 0xcfa   :  { %v4096_v16 = vpop.eup %4095 }
 0xcfb   :  { %v4098_v49 = vpop.eup %4097  ;;  %v1408_v2 = vmul.f32 %v4096_v16, %v1392_v3 }
 0xcfc   :  { %v1407_v43 = vmul.f32 %v4098_v49, %v1391_v18 }
 0xcfd   :  { %v1414_v34 = vmul.f32 %v4575_v15, %v1408_v2 }
 0xcfe   :  { %v1413_v19 = vmul.f32 %v4575_v15, %v1407_v43 }
 0xcff   :  { %v4585_v10 = vadd.f32 %v4577_v14, %v1414_v34 }
 0xd00   :  { %v4582_v11 = vadd.f32 %v4577_v14, %v1413_v19 }
 0xd02   :  { %3489 = vmatprep.mubr.msk.f32.mxu0 %vm111_vm0, %v4582_v11 }
 0xd03   :  { %3490 = vmatmul.mubr.msk.f32.vlgmr.msra.gmra.mrb[20].mxu0 %vm111_vm0, %v4585_v10 }
 0xd04   :  { %3496 = vmatprep.mubr.msk.f32.mxu0 %vm193_vm1, %v4253_v8 }
 0xdd6   :  { %v3491_v3 = vpop.f32.mrb[20].mxu0 }
 0xdd7   :  { %v1499_v18 = vadd.f32 %v3491_v3, %v4257_v9  ;;  %v1493_v61 = vpop.f32.mrb[21].mxu0 }
 0xdd8   :  { %v1494_v42 = vadd.f32 %v4257_v9, %v1493_v61 }
 0xdda   :  { %v3835_v5 = vpack.c.bf16 %v1499_v18, %v1494_v42 }
 0xddc   :  { %3836 = vmatprep.subr.bf16.mxu0 %v3835_v5 }
 0xddd   :  { %3838 = vmatpush3.bf16.msra.mxu0 %v3835_v5 }
 0xdde   :  { %3840 = vmatprep.subr.bf16.mxu0 %v4261_v17 }
 0xde0   :  { %3497 = vmatmul.mubr.msk.f32.vlgmr.msra.gmra.mrb[22].mxu0 %vm193_vm1, %v4263_v20 }
 0xde1   :  { %3499 = vmatprep.mubr.msk.f32.mxu0 %vm193_vm1, %v4265_v21  ;;  %3842 = vmatpush3.bf16.msra.mxu0 %v4261_v17 }
 0xde2   :  { %3844 = vmatprep.subr.bf16.mxu0 %v4268_v22 }
 0xde4   :  { %3500 = vmatmul.mubr.msk.f32.gmra.mrb[24].mxu0 %vm193_vm1, %v4274_v25 }
 0xde5   :  { %3502 = vmatprep.mubr.msk.f32.mxu0 %vm193_vm1, %v4277_v26  ;;  %3846 = vmatpush3.bf16.msra.mxu0 %v4268_v22 }
 0xde6   :  { %3848 = vmatprep.subr.bf16.mxu0 %v4280_v27 }
 0xde8   :  { %3503 = vmatmul.mubr.msk.f32.gmra.mrb[26].mxu0 %vm193_vm1, %v4286_v30 }
 0xde9   :  { %3505 = vmatprep.mubr.msk.f32.mxu0 %vm193_vm1, %v4289_v31  ;;  %3850 = vmatpush3.bf16.msra.mxu0 %v4280_v27 }
 0xdea   :  { %3852 = vmatprep.subr.bf16.mxu0 %v4292_v32 }
 0xdec   :  { %3506 = vmatmul.mubr.msk.f32.gmra.mrb[28].mxu0 %vm193_vm1, %v4298_v35 }
 0xded   :  { %3854 = vmatpush3.bf16.msra.mxu0 %v4292_v32 }
 0xdee   :  { %3856 = vmatprep.subr.bf16.mxu0 %v4302_v36 }
 0xdf1   :  { %3858 = vmatpush3.bf16.msra.mxu0 %v4302_v36 }
 0xdf2   :  { %3860 = vmatprep.subr.bf16.mxu0 %v4309_v39 }
 0xdf5   :  { %3862 = vmatpush3.bf16.msra.mxu0 %v4309_v39 }
 0xeb3   :  { %v3498_v8 = vpop.f32.mrb[22].mxu0 }
 0xeb4   :  { %v1568_v9 = vpop.f32.mrb[23].mxu0  ;;  %v1608_v20 = vmul.f32 %v3498_v8, %v4315_v41 }
 0xeb5   :  { %v1607_v17 = vmul.f32 %v1568_v9, %v4313_v40 }
 0xeb7   :  { %3532 = vmatprep.mubr.msk.f32.mxu0 %vm331_vm2, %v1607_v17  ;;  %v3501_v21 = vpop.f32.mrb[24].mxu0 }
 0xeb8   :  { %v1610_v22 = vmul.f32 %v3501_v21, %v4318_v45  ;;  %3533 = vmatmul.mubr.msk.f32.vlgmr.msra.gmra.mrb[30].mxu0 %vm331_vm2, %v1608_v20  ;;  %v1578_v25 = vpop.f32.mrb[25].mxu0 }
 0xeb9   :  { %v1609_v26 = vmul.f32 %v1578_v25, %v4321_v47 }
 0xebb   :  { %3535 = vmatprep.mubr.msk.f32.mxu0 %vm331_vm2, %v1609_v26  ;;  %v3504_v27 = vpop.f32.mrb[26].mxu0 }
 0xebc   :  { %3536 = vmatmul.mubr.msk.f32.gmra.mrb[32].mxu0 %vm331_vm2, %v1610_v22  ;;  %v1612_v30 = vmul.f32 %v3504_v27, %v4327_v52  ;;  %v1588_v31 = vpop.f32.mrb[27].mxu0 }
 0xebd   :  { %v1611_v32 = vmul.f32 %v1588_v31, %v4329_v53 }
 0xebf   :  { %3538 = vmatprep.mubr.msk.f32.mxu0 %vm331_vm2, %v1611_v32  ;;  %v3507_v35 = vpop.f32.mrb[28].mxu0 }
 0xec0   :  { %3539 = vmatmul.mubr.msk.f32.gmra.mrb[34].mxu0 %vm331_vm2, %v1612_v30  ;;  %v1614_v36 = vmul.f32 %v3507_v35, %v4335_v58  ;;  %v1598_v39 = vpop.f32.mrb[29].mxu0 }
 0xec1   :  { %v1613_v40 = vmul.f32 %v1598_v39, %v4337_v59 }
 0xec3   :  { %3541 = vmatprep.mubr.msk.f32.mxu0 %vm331_vm2, %v1613_v40 }
 0xec4   :  { %3542 = vmatmul.mubr.msk.f32.gmra.mrb[36].mxu0 %vm331_vm2, %v1614_v36 }
 0xf8b   :  { %v3534_v41 = vpop.f32.mrb[30].mxu0 }
 0xf8c   :  { %v1705_v45 = vpop.f32.mrb[31].mxu0 }
 0xf8d   :  { %v4637_v47 = vpack.i.bf16 %v3534_v41, %v1705_v45  ;;  %3560 = vmatprep.mubr.msk.f32.mxu1 %vm485_vm3, %v1705_v45 }
 0xf8f   :  { %4020 = vrot.lane.b32.xlu1 %v4637_v47, %s4198_s0  ;;  %v3537_v52 = vpop.f32.mrb[32].mxu0 }
 0xf90   :  { %v1715_v53 = vpop.f32.mrb[33].mxu0 }
 0xf91   :  { %v4642_v46 = vpack.i.bf16 %v3537_v52, %v1715_v53 }
 0xf93   :  { %4025 = vrot.lane.b32.xlu0 %v4642_v46, %s4198_s0  ;;  %v3540_v58 = vpop.f32.mrb[34].mxu0 }
 0xf94   :  { %v1725_v59 = vpop.f32.mrb[35].mxu0 }
 0xf95   :  { %v4646_v62 = vpack.i.bf16 %v3540_v58, %v1725_v59 }
 0xf97   :  { %4030 = vrot.lane.b32.xlu1 %v4646_v62, %s4198_s0  ;;  %v3543_v56 = vpop.f32.mrb[36].mxu0 }
 0xf98   :  { %v1735_v16 = vpop.f32.mrb[37].mxu0 }
 0xf99   :  { %v4650_v49 = vpack.i.bf16 %v3543_v56, %v1735_v16 }
 0xf9b   :  { %4035 = vrot.lane.b32.xlu1 %v4650_v49, %s4198_s0 }
0x1001   :  { %v4021_v2 = vpop.permute.xlu1 %4020 }
0x1002   :  { %v4023_v43 = vunpack.i.h.bf16 %v4021_v2  ;;  %v4022_v34 = vunpack.i.l.bf16 %v4021_v2 }
0x1004   :  { %v3863_v19 = vpack.c.bf16 %v4023_v43, %v4022_v34 }
0x1005   :  { %v4026_v3 = vpop.permute.xlu0 %4025 }
0x1006   :  { %3865 = vmatprep.subr.msk.bf16.mxu1 %vm4364_vm4, %v3863_v19  ;;  %v4028_v18 = vunpack.i.h.bf16 %v4026_v3  ;;  %v4027_v61 = vunpack.i.l.bf16 %v4026_v3 }
0x1007   :  { %3868 = vmatpush3.bf16.xpose.msk.msra.mxu1 %vm4364_vm4, %v3863_v19 }
0x1008   :  { %v3869_v42 = vpack.c.bf16 %v4028_v18, %v4027_v61 }
0x1009   :  { %v4031_v5 = vpop.permute.xlu1 %4030 }
0x100a   :  { %3871 = vmatprep.subr.msk.bf16.mxu1 %vm4364_vm4, %v3869_v42  ;;  %v4033_v8 = vunpack.i.h.bf16 %v4031_v5  ;;  %v4032_v9 = vunpack.i.l.bf16 %v4031_v5 }
0x100c   :  { %v3875_v17 = vpack.c.bf16 %v4033_v8, %v4032_v9 }
0x100d   :  { %v4036_v20 = vpop.permute.xlu1 %4035 }
0x100e   :  { %v4038_v21 = vunpack.i.h.bf16 %v4036_v20  ;;  %v4037_v22 = vunpack.i.l.bf16 %v4036_v20 }
0x100f   :  { %3874 = vmatpush3.bf16.xpose.msk.msra.mxu1 %vm4364_vm4, %v3869_v42 }
0x1010   :  { %3877 = vmatprep.subr.msk.bf16.mxu1 %vm4364_vm4, %v3875_v17  ;;  %v3881_v25 = vpack.c.bf16 %v4038_v21, %v4037_v22 }
0x1017   :  { %3880 = vmatpush3.bf16.xpose.msk.msra.mxu1 %vm4364_vm4, %v3875_v17 }
0x1018   :  { %3883 = vmatprep.subr.msk.bf16.mxu1 %vm4364_vm4, %v3881_v25 }
0x101f   :  { %3886 = vmatpush3.bf16.xpose.msk.msra.mxu1 %vm4364_vm4, %v3881_v25 }
0x1020   :  { %3600 = vmatprep.subr.mxu1 %v4460_v12 }
0x1026   :  { %3561 = vmatmul.mubr.msk.f32.vlgmr.msra.gmra.mrb[30].mxu1 %vm485_vm3, %v3534_v41 }
0x1027   :  { %3563 = vmatprep.mubr.msk.f32.mxu1 %vm485_vm3, %v1715_v53  ;;  %3601 = vmatpush3.msra.mxu1 %v4460_v12 }
0x1028   :  { %3928 = vmatprep.subr.bf16.mxu1 %v4523_v37 }
0x102a   :  { %3564 = vmatmul.mubr.msk.f32.gmra.mrb[32].mxu1 %vm485_vm3, %v3537_v52 }
0x102b   :  { %3566 = vmatprep.mubr.msk.f32.mxu1 %vm485_vm3, %v1725_v59 }
0x102e   :  { %3567 = vmatmul.mubr.msk.f32.gmra.mrb[34].mxu1 %vm485_vm3, %v3540_v58 }
0x102f   :  { %3569 = vmatprep.mubr.msk.f32.mxu1 %vm485_vm3, %v1735_v16 }
0x1032   :  { %3570 = vmatmul.mubr.msk.f32.gmra.mrb[36].mxu1 %vm485_vm3, %v3543_v56 }
0x10f9   :  { %v3562_v28 = vpop.f32.mrb[30].mxu1 }
0x10fa   :  { %v1872_v26 = vadd.f32 %v3562_v28, %v4391_v54  ;;  %v1866_v27 = vpop.f32.mrb[31].mxu1 }
0x10fb   :  { %v1867_v30 = vadd.f32 %v1866_v27, %v4393_v55 }
0x10fc   :  { %v1908_v12 = vsel %vm623_vm5, %v1872_v26, -inf }
0x10fd   :  { %1909 = vmax.xlane.f32.xlu1 %v1908_v12  ;;  %v3565_v31 = vpop.f32.mrb[32].mxu1  ;;  %v1905_v32 = vsel %vm623_vm5, %v1867_v30, -inf }
0x10fe   :  { %v1876_v35 = vpop.f32.mrb[33].mxu1  ;;  %1906 = vmax.xlane.f32.xlu0 %v1905_v32  ;;  %v1882_v39 = vadd.f32 %v3565_v31, %v4401_v4  ;;  %v4828_v4 = vld [vmem:[#allocation8_spill] sm:$0xff] }
0x10ff   :  { %v1877_v36 = vadd.f32 %v1876_v35, %v4398_v63 }
0x1100   :  { %v1914_v58 = vsel %vm623_vm5, %v1882_v39, -inf }
0x1101   :  { %v3568_v40 = vpop.f32.mrb[34].mxu1  ;;  %v1911_v41 = vsel %vm623_vm5, %v1877_v36, -inf }
0x1102   :  { %v1886_v45 = vpop.f32.mrb[35].mxu1  ;;  %1912 = vmax.xlane.f32.xlu0 %v1911_v41  ;;  %v1892_v55 = vadd.f32 %v3568_v40, %v4408_v23 }
0x1103   :  { %v1887_v54 = vadd.f32 %v1886_v45, %v4404_v13 }
0x1104   :  { %v1920_v2 = vsel %vm623_vm5, %v1892_v55, -inf }
0x1105   :  { %v3571_v52 = vpop.f32.mrb[36].mxu1  ;;  %v1917_v53 = vsel %vm623_vm5, %v1887_v54, -inf }
0x1106   :  { %v1896_v59 = vpop.f32.mrb[37].mxu1  ;;  %1918 = vmax.xlane.f32.xlu1 %v1917_v53  ;;  %1915 = vmax.xlane.f32.xlu0 %v1914_v58  ;;  %v1902_v56 = vadd.f32 %v3571_v52, %v4828_v4 }
0x1107   :  { %v1897_v63 = vadd.f32 %v1896_v59, %v4411_v33 }
0x1108   :  { %v1926_v13 = vsel %vm623_vm5, %v1902_v56, -inf }
0x1109   :  { %v1923_v16 = vsel %vm623_vm5, %v1897_v63, -inf }
0x110a   :  { %1924 = vmax.xlane.f32.xlu1 %v1923_v16  ;;  %1921 = vmax.xlane.f32.xlu0 %v1920_v2 }
0x110e   :  { %1927 = vmax.xlane.f32.xlu0 %v1926_v13 }
0x111b   :  { %4040 = vrot.lane.b32.xlu1 %v4637_v47, %s4199_s26 }
0x118a   :  { %v1910_v23 = vpop.xlane.xlu1 %1909 }
0x118b   :  { %v1930_v43 = vsub.f32 %v1872_v26, %v1910_v23  ;;  %v1907_v34 = vpop.xlane.xlu0 %1906 }
0x118c   :  { %v1929_v19 = vsub.f32 %v1867_v30, %v1907_v34 }
0x118d   :  { %v1939_v3 = vmul.f32 1.442695, %v1930_v43 }
0x118e   :  { %v1937_v33 = vmul.f32 1.442695, %v1929_v19 }
0x118f   :  { %4099 = vpow2.f32 %v1939_v3  ;;  %v1913_v18 = vpop.xlane.xlu0 %1912 }
0x1190   :  { %4101 = vpow2.f32 %v1937_v33  ;;  %v1931_v61 = vsub.f32 %v1877_v36, %v1913_v18 }
0x1192   :  { %v1941_v42 = vmul.f32 1.442695, %v1931_v61 }
0x1193   :  { %v1919_v5 = vpop.xlane.xlu1 %1918  ;;  %v1916_v8 = vpop.xlane.xlu0 %1915 }
0x1194   :  { %4103 = vpow2.f32 %v1941_v42  ;;  %v1933_v9 = vsub.f32 %v1887_v54, %v1919_v5  ;;  %v1932_v17 = vsub.f32 %v1882_v39, %v1916_v8 }
0x1196   :  { %v1945_v20 = vmul.f32 1.442695, %v1933_v9  ;;  %v1943_v21 = vmul.f32 1.442695, %v1932_v17 }
0x1197   :  { %v1925_v22 = vpop.xlane.xlu1 %1924  ;;  %v1922_v47 = vpop.xlane.xlu0 %1921 }
0x1198   :  { %4105 = vpow2.f32 %v1945_v20  ;;  %v1934_v25 = vsub.f32 %v1892_v55, %v1922_v47  ;;  %v1935_v12 = vsub.f32 %v1897_v63, %v1925_v22 }
0x1199   :  { %v4698_v28 = vpop.eup %4099  ;;  %4107 = vpow2.f32 %v1943_v21 }
0x119a   :  { %v4102_v26 = vpop.eup %4101  ;;  %v1947_v27 = vmul.f32 1.442695, %v1934_v25  ;;  %v1956_v30 = vsel %vm623_vm5, %v4698_v28, 0.0  ;;  %v1949_v55 = vmul.f32 1.442695, %v1935_v12 }
0x119b   :  { %v4041_v31 = vpop.permute.xlu1 %4040  ;;  %1957 = vadd.xlane.f32.xlu0 %v1956_v30  ;;  %v1928_v32 = vpop.xlane.xlu0 %1927  ;;  %v1953_v35 = vsel %vm623_vm5, %v4102_v26, 0.0 }
0x119c   :  { %v4043_v36 = vunpack.i.h.bf16 %v4041_v31  ;;  %v4042_v39 = vunpack.i.l.bf16 %v4041_v31  ;;  %v1936_v40 = vsub.f32 %v1902_v56, %v1928_v32  ;;  %1954 = vadd.xlane.f32.xlu1 %v1953_v35  ;;  %4109 = vpow2.f32 %v1947_v27 }
0x119e   :  { %v4703_v41 = vpop.eup %4103  ;;  %v3887_v45 = vpack.c.bf16 %v4043_v36, %v4042_v39  ;;  %v1951_v54 = vmul.f32 1.442695, %v1936_v40 }
0x119f   :  { %v1959_v52 = vsel %vm623_vm5, %v4703_v41, 0.0 }
0x11a0   :  { %4111 = vpow2.f32 %v1951_v54  ;;  %3888 = vmatprep.subr.bf16.mxu0 %v3887_v45  ;;  %1960 = vadd.xlane.f32.xlu1 %v1959_v52 }
0x11a1   :  { %3890 = vmatpush3.bf16.msra.mxu0 %v3887_v45  ;;  %4113 = vpow2.f32 %v1949_v55 }
0x11a2   :  { %v4707_v53 = vpop.eup %4105 }
0x11a3   :  { %v4709_v58 = vpop.eup %4107  ;;  %v1965_v59 = vsel %vm623_vm5, %v4707_v53, 0.0 }
0x11a4   :  { %1966 = vadd.xlane.f32.xlu1 %v1965_v59  ;;  %v1962_v63 = vsel %vm623_vm5, %v4709_v58, 0.0 }
0x11a5   :  { %1963 = vadd.xlane.f32.xlu0 %v1962_v63 }
0x11a6   :  { %v4715_v4 = vpop.eup %4109 }
0x11a7   :  { %v1968_v56 = vsel %vm623_vm5, %v4715_v4, 0.0 }
0x11a9   :  { %1969 = vadd.xlane.f32.xlu0 %v1968_v56 }
0x11aa   :  { %v4719_v16 = vpop.eup %4111 }
0x11ab   :  { %v1974_v2 = vsel %vm623_vm5, %v4719_v16, 0.0  ;;  %v4114_v13 = vpop.eup %4113 }
0x11ac   :  { %v1971_v23 = vsel %vm623_vm5, %v4114_v13, 0.0 }
0x11ad   :  { %1975 = vadd.xlane.f32.xlu0 %v1974_v2  ;;  %v4139_v2 = vld [vmem:[#allocation2 + $0x128] sm:$0xff] }
0x11b1   :  { %1972 = vadd.xlane.f32.xlu0 %v1971_v23 }
0x11b5   :  { %4050 = vrot.lane.b32.xlu1 %v4646_v62, %s4199_s26 }
0x11b9   :  { %4055 = vrot.lane.b32.xlu1 %v4650_v49, %s4199_s26 }
0x11c7   :  { %4045 = vrot.lane.b32.xlu0 %v4642_v46, %s4199_s26 }
0x1228   :  { %v1958_v34 = vpop.xlane.xlu0 %1957 }
0x1229   :  { %v1955_v43 = vpop.xlane.xlu1 %1954 }
0x122a   :  { %4115 = vrcp.f32 %v1955_v43  ;;  %v4140_v43 = vld [vmem:[#allocation2 + $0x120] sm:$0xff] }
0x122b   :  { %4117 = vrcp.f32 %v1958_v34 }
0x122d   :  { %v1961_v19 = vpop.xlane.xlu1 %1960 }
0x122e   :  { %4119 = vrcp.f32 %v1961_v19 }
0x1231   :  { %v1967_v42 = vpop.xlane.xlu1 %1966 }
0x1232   :  { %v1964_v3 = vpop.xlane.xlu0 %1963 }
0x1233   :  { %4121 = vrcp.f32 %v1964_v3 }
0x1234   :  { %v4116_v33 = vpop.eup %4115  ;;  %4123 = vrcp.f32 %v1967_v42 }
0x1235   :  { %v1985_v18 = vmul.f32 %v4116_v33, %v4102_v26  ;;  %v4051_v8 = vpop.permute.xlu1 %4050  ;;  %v4118_v30 = vpop.eup %4117 }
0x1236   :  { %v1970_v61 = vpop.xlane.xlu0 %1969  ;;  %v4053_v17 = vunpack.i.h.bf16 %v4051_v8  ;;  %v4052_v49 = vunpack.i.l.bf16 %v4051_v8  ;;  %v1986_v31 = vmul.f32 %v4118_v30, %v4698_v28 }
0x1237   :  { %3588 = vmatprep.mubr.msk.f32.mxu0 %vm623_vm5, %v1985_v18  ;;  %4125 = vrcp.f32 %v1970_v61  ;;  %v4142_v61 = vld [vmem:[#allocation2 + $0x130] sm:$0xff] }
0x1238   :  { %v3895_v47 = vpack.c.bf16 %v4053_v17, %v4052_v49  ;;  %v4120_v12 = vpop.eup %4119  ;;  %v4144_v49 = vld [vmem:[#allocation2 + $0x140] sm:$0xff] }
0x1239   :  { %v4056_v46 = vpop.permute.xlu1 %4055  ;;  %v1987_v35 = vmul.f32 %v4120_v12, %v4703_v41 }
0x123a   :  { %v1976_v5 = vpop.xlane.xlu0 %1975  ;;  %v4058_v25 = vunpack.i.h.bf16 %v4056_v46  ;;  %v4057_v27 = vunpack.i.l.bf16 %v4056_v46 }
0x123c   :  { %v3899_v26 = vpack.c.bf16 %v4058_v25, %v4057_v27  ;;  %v4146_v27 = vld [vmem:[#allocation2 + $0x150] sm:$0xff] }
0x123d   :  { %v4122_v32 = vpop.eup %4121 }
0x123e   :  { %v1973_v62 = vpop.xlane.xlu0 %1972  ;;  %v4124_v36 = vpop.eup %4123  ;;  %v1988_v39 = vmul.f32 %v4122_v32, %v4709_v58 }
0x123f   :  { %4127 = vrcp.f32 %v1973_v62  ;;  %v1989_v45 = vmul.f32 %v4124_v36, %v4707_v53  ;;  %v4143_v62 = vld [vmem:[#allocation2 + $0x148] sm:$0xff] }
0x1240   :  { %4129 = vrcp.f32 %v1976_v5 }
0x1241   :  { %v4126_v40 = vpop.eup %4125 }
0x1242   :  { %v4046_v9 = vpop.permute.xlu0 %4045  ;;  %v1990_v28 = vmul.f32 %v4126_v40, %v4715_v4 }
0x1243   :  { %v4048_v20 = vunpack.i.h.bf16 %v4046_v9  ;;  %v4047_v21 = vunpack.i.l.bf16 %v4046_v9 }
0x1245   :  { %v3891_v22 = vpack.c.bf16 %v4048_v20, %v4047_v21 }
0x1247   :  { %3892 = vmatprep.subr.bf16.mxu0 %v3891_v22 }
0x1248   :  { %3894 = vmatpush3.bf16.msra.mxu0 %v3891_v22  ;;  %v4145_v22 = vld [vmem:[#allocation2 + $0x158] sm:$0xff] }
0x1249   :  { %3896 = vmatprep.subr.bf16.mxu0 %v3895_v47  ;;  %v4128_v54 = vpop.eup %4127 }
0x124a   :  { %v4130_v55 = vpop.eup %4129  ;;  %v1991_v52 = vmul.f32 %v4128_v54, %v4114_v13 }
0x124b   :  { %v1992_v41 = vmul.f32 %v4130_v55, %v4719_v16 }
0x124c   :  { %3898 = vmatpush3.bf16.msra.mxu0 %v3895_v47 }
0x124d   :  { %3900 = vmatprep.subr.bf16.mxu0 %v3899_v26 }
0x1250   :  { %3902 = vmatpush3.bf16.msra.mxu0 %v3899_v26 }
0x1253   :  { %3589 = vmatmul.mubr.msk.f32.vlgmr.msra.gmra.mrb[38].mxu0 %vm623_vm5, %v1986_v31 }
0x1254   :  { %3591 = vmatprep.mubr.msk.f32.mxu0 %vm623_vm5, %v1987_v35 }
0x1257   :  { %3592 = vmatmul.mubr.msk.f32.gmra.mrb[40].mxu0 %vm623_vm5, %v1988_v39 }
0x1258   :  { %3594 = vmatprep.mubr.msk.f32.mxu0 %vm623_vm5, %v1989_v45 }
0x125b   :  { %3595 = vmatmul.mubr.msk.f32.gmra.mrb[42].mxu0 %vm623_vm5, %v1990_v28 }
0x125c   :  { %3597 = vmatprep.mubr.msk.f32.mxu0 %vm623_vm5, %v1991_v52 }
0x125f   :  { %3598 = vmatmul.mubr.msk.f32.gmra.mrb[44].mxu0 %vm623_vm5, %v1992_v41 }
0x1260   :  { %3630 = vmatprep.mubr.msk.f32.mxu0 %vm623_vm5, %v4487_v44 }
0x1326   :  { %v3590_v53 = vpop.f32.mrb[38].mxu0 }
0x1327   :  { %v2107_v58 = vpop.f32.mrb[39].mxu0 }
0x1328   :  { %3602 = vmatprep.mubr.msk.f32.mxu1 %vm485_vm3, %v2107_v58 }
0x1329   :  { %3603 = vmatmul.mubr.msk.f32.vlgmr.msra.gmra.mrb[38].mxu1 %vm485_vm3, %v3590_v53 }
0x132a   :  { %v3593_v59 = vpop.f32.mrb[40].mxu0  ;;  %3930 = vmatpush3.bf16.msra.mxu1 %v4523_v37 }
0x132b   :  { %v2117_v63 = vpop.f32.mrb[41].mxu0  ;;  %3932 = vmatprep.subr.bf16.mxu1 %v4527_v50 }
0x132c   :  { %3605 = vmatprep.mubr.msk.f32.mxu1 %vm485_vm3, %v2117_v63 }
0x132d   :  { %3606 = vmatmul.mubr.msk.f32.gmra.mrb[40].mxu1 %vm485_vm3, %v3593_v59 }
0x132e   :  { %v3596_v4 = vpop.f32.mrb[42].mxu0  ;;  %3934 = vmatpush3.bf16.msra.mxu1 %v4527_v50  ;;  %v4141_v50 = vld [vmem:[#allocation2 + $0x138] sm:$0xff] }
0x132f   :  { %v2127_v44 = vpop.f32.mrb[43].mxu0 }
0x1330   :  { %3608 = vmatprep.mubr.msk.f32.mxu1 %vm485_vm3, %v2127_v44 }
0x1331   :  { %3609 = vmatmul.mubr.msk.f32.gmra.mrb[42].mxu1 %vm485_vm3, %v3596_v4 }
0x1332   :  { %v3599_v56 = vpop.f32.mrb[44].mxu0 }
0x1333   :  { %v2137_v16 = vpop.f32.mrb[45].mxu0 }
0x1334   :  { %3611 = vmatprep.mubr.msk.f32.mxu1 %vm485_vm3, %v2137_v16 }
0x1335   :  { %3612 = vmatmul.mubr.msk.f32.gmra.mrb[44].mxu1 %vm485_vm3, %v3599_v56 }
0x13fc   :  { %v3604_v37 = vpop.f32.mrb[38].mxu1 }
0x13fd   :  { %v2276_v13 = vmul.f32 %v4139_v2, %v3604_v37  ;;  %v2236_v23 = vpop.f32.mrb[39].mxu1 }
0x13fe   :  { %v2275_v34 = vmul.f32 %v4140_v43, %v2236_v23  ;;  %v4829_v43 = vld [vmem:[#allocation9_spill] sm:$0xff] }
0x1400   :  { %v3903_v19 = vpack.c.bf16 %v2276_v13, %v2275_v34  ;;  %v3607_v3 = vpop.f32.mrb[40].mxu1 }
0x1401   :  { %v2278_v33 = vmul.f32 %v4141_v50, %v3607_v3  ;;  %v2246_v18 = vpop.f32.mrb[41].mxu1 }
0x1402   :  { %v2277_v42 = vmul.f32 %v4142_v61, %v2246_v18  ;;  %3904 = vmatprep.subr.bf16.mxu0 %v3903_v19 }
0x1403   :  { %3906 = vmatpush3.bf16.msra.mxu0 %v3903_v19 }
0x1404   :  { %v3907_v5 = vpack.c.bf16 %v2278_v33, %v2277_v42  ;;  %v3610_v8 = vpop.f32.mrb[42].mxu1 }
0x1405   :  { %v2280_v9 = vmul.f32 %v4143_v62, %v3610_v8  ;;  %v2256_v17 = vpop.f32.mrb[43].mxu1 }
0x1406   :  { %v2279_v20 = vmul.f32 %v4144_v49, %v2256_v17  ;;  %3908 = vmatprep.subr.bf16.mxu0 %v3907_v5 }
0x1407   :  { %3910 = vmatpush3.bf16.msra.mxu0 %v3907_v5 }
0x1408   :  { %v3911_v21 = vpack.c.bf16 %v2280_v9, %v2279_v20  ;;  %v3613_v46 = vpop.f32.mrb[44].mxu1 }
0x1409   :  { %v2282_v47 = vmul.f32 %v4145_v22, %v3613_v46  ;;  %v2266_v25 = vpop.f32.mrb[45].mxu1 }
0x140a   :  { %v2281_v26 = vmul.f32 %v4146_v27, %v2266_v25  ;;  %3912 = vmatprep.subr.bf16.mxu0 %v3911_v21  ;;  %v46_v27 = vld [vmem:[#allocation2 + $0xa0] sm:$0xff] }
0x140b   :  { %3914 = vmatpush3.bf16.msra.mxu0 %v3911_v21 }
0x140c   :  { %v3915_v30 = vpack.c.bf16 %v2282_v47, %v2281_v26  ;;  %v47_v26 = vld [vmem:[#allocation2 + $0xa8] sm:$0xff] }
0x140e   :  { %3916 = vmatprep.subr.bf16.mxu0 %v3915_v30 }
0x140f   :  { %3918 = vmatpush3.bf16.msra.mxu0 %v3915_v30  ;;  %v3951_v30 = vpack.c.bf16 %v47_v26, %v46_v27 }
0x1410   :  { %3920 = vmatprep.subr.bf16.mxu0 %v4499_v38 }
0x1411   :  { %3952 = vmatprep.subr.bf16.mxu1 %v3951_v30 }
0x1412   :  { %3631 = vmatmul.mubr.msk.f32.vlgmr.msra.gmra.mrb[46].mxu0 %vm623_vm5, %v4501_v51 }
0x1413   :  { %3922 = vmatpush3.bf16.msra.mxu0 %v4499_v38 }
0x1414   :  { %3924 = vmatprep.subr.bf16.mxu0 %v4504_v48 }
0x1417   :  { %3926 = vmatpush3.bf16.msra.mxu0 %v4504_v48 }
0x1418   :  { %3936 = vmatprep.subr.bf16.mxu0 %v4532_v29 }
0x14e5   :  { %v3632_v12 = vpop.f32.mrb[46].mxu0 }
0x14e6   :  { %v2349_v31 = vpop.f32.mrb[47].mxu0 }
0x14e7   :  { %3641 = vmatprep.mubr.msk.f32.mxu0 %vm111_vm0, %v2349_v31  ;;  %v49_v31 = vld [vmem:[#allocation2 + $0xb8] sm:$0xff] }
0x14e8   :  { %3642 = vmatmul.mubr.msk.f32.vlgmr.msra.gmra.mrb[48].mxu0 %vm111_vm0, %v3632_v12  ;;  %v48_v12 = vld [vmem:[#allocation2 + $0xb0] sm:$0xff] }
0x14e9   :  { %3938 = vmatpush3.bf16.msra.mxu0 %v4532_v29 }
0x14ea   :  { %3940 = vmatprep.subr.bf16.mxu0 %v4534_v0 }
0x14ed   :  { %3942 = vmatpush3.bf16.msra.mxu0 %v4534_v0 }
0x14ee   :  { %3944 = vmatprep.subr.bf16.mxu0 %v4539_v24 }
0x14f1   :  { %3946 = vmatpush3.bf16.msra.mxu0 %v4539_v24 }
0x14f2   :  { %3948 = vmatprep.subr.bf16.mxu0 %v4557_v1 }
0x14f5   :  { %3950 = vmatpush3.bf16.msra.mxu0 %v4557_v1 }
0x15bb   :  { %v3643_v38 = vpop.f32.mrb[48].mxu0 }
0x15bc   :  { %v2436_v51 = vadd.f32 %v3643_v38, %v4513_v60  ;;  %v2430_v48 = vpop.f32.mrb[49].mxu0  ;;  %v3955_v38 = vpack.c.bf16 %v49_v31, %v48_v12 }
0x15bd   :  { %v2431_v32 = vadd.f32 %v4513_v60, %v2430_v48  ;;  %v92_v48 = vld [vmem:[#allocation2 + $0x220] sm:$0xff] }
0x15be   :  { %v2440_v29 = vadd.f32 %v2436_v51, %v4585_v10  ;;  %v91_v51 = vld [vmem:[#allocation2 + $0x218] sm:$0xff] }
0x15bf   :  { %v2439_v35 = vadd.f32 %v2431_v32, %v4582_v11  ;;  %v3959_v32 = vpack.c.bf16 %v92_v48, %v91_v51 }
0x15c0   :  { %v2444_v0 = vsel %vm111_vm0, %v2440_v29, 0.0 }
0x15c1   :  { %2445 = vadd.xlane.f32.xlu0 %v2444_v0  ;;  %v2441_v36 = vsel %vm111_vm0, %v2439_v35, 0.0 }
0x15c2   :  { %2442 = vadd.xlane.f32.xlu1 %v2441_v36 }
0x164e   :  { %v2446_v24 = vpop.xlane.xlu0 %2445 }
0x164f   :  { %v2448_v39 = vmul.f32 0.03125, %v2446_v24  ;;  %v2443_v40 = vpop.xlane.xlu1 %2442 }
0x1650   :  { %v2447_v1 = vmul.f32 0.03125, %v2443_v40 }
0x1651   :  { %v2450_v45 = vsub.f32 %v2440_v29, %v2448_v39 }
0x1652   :  { %v2449_v54 = vsub.f32 %v2439_v35, %v2447_v1 }
0x1653   :  { %v2452_v28 = vmul.f32 %v2450_v45, %v2450_v45 }
0x1654   :  { %v2451_v55 = vmul.f32 %v2449_v54, %v2449_v54 }
0x1655   :  { %v2456_v60 = vsel %vm111_vm0, %v2452_v28, 0.0 }
0x1656   :  { %2457 = vadd.xlane.f32.xlu0 %v2456_v60  ;;  %v2453_v10 = vsel %vm111_vm0, %v2451_v55, 0.0 }
0x1657   :  { %2454 = vadd.xlane.f32.xlu1 %v2453_v10 }
0x16e3   :  { %v2458_v11 = vpop.xlane.xlu0 %2457 }
0x16e4   :  { %v2460_v52 = vmul.f32 0.03125, %v2458_v11  ;;  %v2455_v41 = vpop.xlane.xlu1 %2454  ;;  %v93_v11 = vld [vmem:[#allocation2 + $0x228] sm:$0xff] }
0x16e5   :  { %v2459_v53 = vmul.f32 0.03125, %v2455_v41 }
0x16e6   :  { %v2462_v58 = vadd.f32 1e-05, %v2460_v52  ;;  %v94_v52 = vld [vmem:[#allocation2 + $0x230] sm:$0xff] }
0x16e7   :  { %v2461_v59 = vadd.f32 1e-05, %v2459_v53  ;;  %v3963_v41 = vpack.c.bf16 %v94_v52, %v93_v11  ;;  %v89_v53 = vld [vmem:[#allocation2 + $0x208] sm:$0xff] }
0x16e8   :  { %4131 = vrsqrt.f32 %v2462_v58  ;;  %v90_v58 = vld [vmem:[#allocation2 + $0x210] sm:$0xff] }
0x16e9   :  { %4133 = vrsqrt.f32 %v2461_v59 }
0x16f2   :  { %v4132_v63 = vpop.eup %4131 }
0x16f3   :  { %v4134_v4 = vpop.eup %4133  ;;  %v2466_v44 = vmul.f32 %v4132_v63, %v2450_v45 }
0x16f4   :  { %v2465_v56 = vmul.f32 %v4134_v4, %v2449_v54 }
0x16f5   :  { %v2468_v16 = vmul.f32 %v4544_v7, %v2466_v44  ;;  %v4202_v44 = vmov 0.0  }
0x16f6   :  { %v2467_v37 = vmul.f32 %v4544_v7, %v2465_v56 }
0x16f7   :  { %v2470_v13 = vadd.f32 %v4546_v57, %v2468_v16 }
0x16f8   :  { %v2469_v2 = vadd.f32 %v4546_v57, %v2467_v37 }
0x16fa   :  { %3652 = vmatprep.mubr.msk.f32.mxu1 %vm111_vm0, %v2469_v2 }
0x16fb   :  { %3653 = vmatmul.mubr.msk.f32.vlgmr.msra.gmra.mrb[46].mxu1 %vm111_vm0, %v2470_v13 }
0x16fc   :  { %3954 = vmatpush3.bf16.msra.mxu1 %v3951_v30 }
0x16fd   :  { %3956 = vmatprep.subr.bf16.mxu1 %v3955_v38 }
0x1700   :  { %3958 = vmatpush3.bf16.msra.mxu1 %v3955_v38 }
0x1701   :  { %3960 = vmatprep.subr.bf16.mxu1 %v3959_v32 }
0x17ce   :  { %v3654_v23 = vpop.f32.mrb[46].mxu1 }
0x17cf   :  { %v2549_v34 = vadd.f32 %v3654_v23, %v4829_v43  ;;  %v2543_v19 = vpop.f32.mrb[47].mxu1 }
0x17d0   :  { %v2544_v3 = vadd.f32 %v4829_v43, %v2543_v19 }
0x17d1   :  { %v2553_v33 = vmax.f32 %v2549_v34, 0.0 }
0x17d2   :  { %v2552_v50 = vmax.f32 %v2544_v3, 0.0 }
0x17d4   :  { %3671 = vmatprep.mubr.msk.f32.mxu0 %vm623_vm5, %v2552_v50 }
0x17d5   :  { %3672 = vmatmul.mubr.msk.f32.vlgmr.msra.gmra.mrb[50].mxu0 %vm623_vm5, %v2553_v33 }
0x17d6   :  { %3700 = vmatprep.mubr.msk.f32.mxu0 %vm4201_vm6, %v4202_v44 }
0x18a8   :  { %v3673_v7 = vpop.f32.mrb[50].mxu0 }
0x18a9   :  { %v2632_v18 = vadd.f32 %v3673_v7, %v4567_v6  ;;  %v2626_v57 = vpop.f32.mrb[51].mxu0 }
0x18aa   :  { %v2627_v61 = vadd.f32 %v4567_v6, %v2626_v57 }
0x18ab   :  { %v2636_v42 = vadd.f32 %v2632_v18, %v2470_v13  ;;  %v3053_v13 = vld [vmem:[#allocation2 + $0xc8] ss:$0 sm:$0xff] }
0x18ac   :  { %v2635_v5 = vadd.f32 %v2627_v61, %v2469_v2  ;;  %v95_v2 = vld [vmem:[#allocation2 + $0x238] sm:$0x3] }
0x18ad   :  { %v2640_v8 = vsel %vm111_vm0, %v2636_v42, 0.0 }
0x18ae   :  { %2641 = vadd.xlane.f32.xlu0 %v2640_v8  ;;  %v2637_v62 = vsel %vm111_vm0, %v2635_v5, 0.0 }
0x18af   :  { %2638 = vadd.xlane.f32.xlu1 %v2637_v62 }
0x193b   :  { %v2642_v9 = vpop.xlane.xlu0 %2641 }
0x193c   :  { %v2644_v17 = vmul.f32 0.03125, %v2642_v9  ;;  %v2639_v49 = vpop.xlane.xlu1 %2638 }
0x193d   :  { %v2643_v20 = vmul.f32 0.03125, %v2639_v49 }
0x193e   :  { %v2646_v21 = vsub.f32 %v2636_v42, %v2644_v17 }
0x193f   :  { %v2645_v46 = vsub.f32 %v2635_v5, %v2643_v20 }
0x1940   :  { %v2648_v22 = vmul.f32 %v2646_v21, %v2646_v21 }
0x1941   :  { %v2647_v47 = vmul.f32 %v2645_v46, %v2645_v46 }
0x1942   :  { %v2652_v25 = vsel %vm111_vm0, %v2648_v22, 0.0 }
0x1943   :  { %2653 = vadd.xlane.f32.xlu0 %v2652_v25  ;;  %v2649_v6 = vsel %vm111_vm0, %v2647_v47, 0.0 }
0x1944   :  { %2650 = vadd.xlane.f32.xlu1 %v2649_v6 }
0x19d0   :  { %v2654_v29 = vpop.xlane.xlu0 %2653 }
0x19d1   :  { %v2656_v35 = vmul.f32 0.03125, %v2654_v29  ;;  %v2651_v0 = vpop.xlane.xlu1 %2650 }
0x19d2   :  { %v2655_v36 = vmul.f32 0.03125, %v2651_v0 }
0x19d3   :  { %v2658_v24 = vadd.f32 1e-05, %v2656_v35 }
0x19d4   :  { %v2657_v39 = vadd.f32 1e-05, %v2655_v36 }
0x19d5   :  { %4135 = vrsqrt.f32 %v2658_v24 }
0x19d6   :  { %4137 = vrsqrt.f32 %v2657_v39 }
0x19df   :  { %v4136_v40 = vpop.eup %4135 }
0x19e0   :  { %v4138_v1 = vpop.eup %4137  ;;  %v2662_v45 = vmul.f32 %v4136_v40, %v2646_v21 }
0x19e1   :  { %v2661_v54 = vmul.f32 %v4138_v1, %v2645_v46 }
0x19e2   :  { %v2664_v28 = vmul.f32 %v4575_v15, %v2662_v45 }
0x19e3   :  { %v2663_v55 = vmul.f32 %v4575_v15, %v2661_v54 }
0x19e4   :  { %v2666_v10 = vadd.f32 %v4577_v14, %v2664_v28 }
0x19e5   :  { %v2665_v60 = vadd.f32 %v4577_v14, %v2663_v55  ;;  %v4200_v14 = vmov 0.0|0.0  }
0x19e6   :  { %3967 = vmatprep.subr.bf16.mxu0 %v4200_v14 }
0x19e7   :  { %3682 = vmatprep.mubr.msk.f32.mxu1 %vm111_vm0, %v2665_v60 }
0x19e8   :  { %3683 = vmatmul.mubr.msk.f32.vlgmr.msra.gmra.mrb[48].mxu1 %vm111_vm0, %v2666_v10 }
0x19e9   :  { %3962 = vmatpush3.bf16.msra.mxu1 %v3959_v32 }
0x19ea   :  { %3964 = vmatprep.subr.bf16.mxu1 %v3963_v41 }
0x19ed   :  { %3966 = vmatpush3.bf16.msra.mxu1 %v3963_v41 }
0x1abb   :  { %v3684_v59 = vpop.f32.mrb[48].mxu1 }
0x1abc   :  { %v2739_v63 = vpop.f32.mrb[49].mxu1  ;;  %v2749_v15 = vmul.f32 %v3684_v59, %v90_v58 }
0x1abd   :  { %v2748_v4 = vmul.f32 %v2739_v63, %v89_v53 }
0x1abf   :  { %3693 = vmatprep.mubr.msk.f32.mxu1 %vm111_vm0, %v2748_v4 }
0x1ac0   :  { %3694 = vmatmul.mubr.msk.f32.vlgmr.msra.gmra.mrb[50].mxu1 %vm111_vm0, %v2749_v15 }
0x1b93   :  { %v3695_v56 = vpop.f32.mrb[50].mxu1 }
0x1b94   :  { %v2822_v16 = vpop.f32.mrb[51].mxu1 }
0x1b95   :  { %v3968_v37 = vpack.c.bf16 %v3695_v56, %v2822_v16 }
0x1b97   :  { %3969 = vmatpush3.bf16.msra.mxu0 %v3968_v37 }
0x1b9a   :  { %3701 = vmatmul.mubr.msk.f32.vlgmr.msra.gmra.mrb[52].mxu0 %vm193_vm1, %v95_v2 }
0x1c6d   :  { %v2904_v23 = vpop.f32.mrb[52].mxu0 }
0x1c6e   :  { %v2905_v43 = vadd.f32 %v3053_v13, %v2904_v23  ;;  %v3702_v34 = vpop.f32.mrb[53].mxu0 }
0x1c70   :  { %2909 = vst.msk [vmem:[#allocation5] sm:$0x3] %vm2908_vm7, %v2905_v43 }
0x1c71   :  { %4180 = shalt.err (!%p4177_p12)
}
0x1c72   :  { %s4181_s4 = scalar_lea.hbm %s4820_s2, 32 }
0x1c73   :  { %p4182_p13 = scmp.ne.s32.totalorder %s4820_s2, %s4181_s4  ;;  %p4185_p0 = scmp.lt.u32.totalorder %s4181_s4, %s4820_s2 }
0x1c75   :  { %p4187_p1 = pnand %p4185_p0, %p4182_p13 }
0x1c77   :  { %4190 = shalt.err (!%p4187_p1)
}
0x1c78   :  { %2919 = dma.vmem_to_hbm [thread:$0]  %s2917_s28, 32, %s4820_s2, [#allocation4]  }
0x1c79   :  { %4193 = dma.done.wait [#allocation4], 32  }
0x1c7a   :  { %4194 = vsyncadd [#allocation4], 4294967264 }
0x1c7b   :  { %2923 = vsyncpa [#allocation3], 1 }
0x1c7c   :  { %2924 = vsyncpa [#allocation4], 1 }

</bundles_post_ra>
